<compile_context>
chip_gen: v7x
topology: tpu7x:2x2x1
jax: 0.10.0
libtpu: 0.0.40
codegen_flags: <defaults>
</compile_context>

<pallas_src>
import jax
import jax.numpy as jnp
from jax import lax
from jax.experimental import pallas as pl
from jax.experimental.pallas import tpu as pltpu


# ----------------------------- fused Pallas kernel -------------------------- #

def _lenet2_kernel(x_ref, t1_ref, b1_ref, p1r_ref, p1c_ref,
                   t2_ref, b2_ref, p2r_ref, p2c_ref,
                   g1_ref, fb1_ref, w2_ref, fb2_ref, w3_ref, fb3_ref,
                   o_ref):
    f32 = jnp.float32
    nb, h0, _ = x_ref.shape
    k1, _, l1 = t1_ref.shape          # l1 = Cout1*OW1
    oh1 = h0 - k1 + 1                 # 28
    k2, _, l2 = t2_ref.shape          # l2 = Cout2*OW2
    ph1 = p1r_ref.shape[1]            # 14
    oh2 = ph1 - k2 + 1                # 10
    nh = g1_ref.shape[0]              # 5 (pooled rows folded into fc1)

    def mm(a, b):
        return jnp.dot(a, b, preferred_element_type=f32)

    for n in range(nb):
        # ---- conv1 (+bias, ReLU): sum of row-shifted Toeplitz matmuls ----
        y = jnp.zeros((oh1, l1), f32)
        for kh in range(k1):
            y = y + mm(x_ref[n, kh:kh + oh1, :], t1_ref[kh])
        y = jnp.maximum(y + b1_ref[...], 0.0)                        # (28, 168)

        # ---- maxpool1 (2x2) via exact 0/1 selection matmuls ----
        r = jnp.maximum(mm(p1r_ref[0], y), mm(p1r_ref[1], y))        # (14, 168)
        a1 = jnp.maximum(mm(r, p1c_ref[0]), mm(r, p1c_ref[1]))       # (14, 84)

        # ---- conv2 (+bias, ReLU) ----
        y = jnp.zeros((oh2, l2), f32)
        for kh in range(k2):
            y = y + mm(a1[kh:kh + oh2, :], t2_ref[kh])
        y = jnp.maximum(y + b2_ref[...], 0.0)                        # (10, 160)

        # ---- maxpool2 (2x2) ----
        r = jnp.maximum(mm(p2r_ref[0], y), mm(p2r_ref[1], y))        # (5, 160)
        a2 = jnp.maximum(mm(r, p2c_ref[0]), mm(r, p2c_ref[1]))       # (5, 80)

        # ---- fc1 (flatten folded into per-row weight slabs), fc2, fc3 ----
        f = fb1_ref[...]
        for hh in range(nh):
            f = f + mm(a2[hh:hh + 1, :], g1_ref[hh])                 # (1, 120)
        f = jnp.maximum(f, 0.0)
        f = jnp.maximum(mm(f, w2_ref[...]) + fb2_ref[...], 0.0)      # (1, 84)
        o_ref[n] = mm(f, w3_ref[...]) + fb3_ref[...]                 # (1, 10)


# ------------------------- weight preprocessing (one-time) ------------------ #

def _toeplitz_conv(w_oihw, w_in):
    """(Cout,Cin,K,K) -> (K, Cin*W_in, Cout*OW) per-kh Toeplitz matmul slabs."""
    cout, cin, k, _ = w_oihw.shape
    ow = w_in - k + 1
    eye = jnp.eye(ow, dtype=jnp.float32)
    slabs = []
    for kh in range(k):
        t = jnp.zeros((cin * w_in, cout * ow), jnp.float32)
        for kw in range(k):
            s = jnp.zeros((w_in, ow), jnp.float32).at[kw:kw + ow, :].set(eye)
            t = t + jnp.kron(w_oihw[:, :, kh, kw].T.astype(jnp.float32), s)
        slabs.append(t)
    return jnp.stack(slabs, axis=0)


def _pool_row_selectors(oh):
    ph = oh // 2
    p = jnp.arange(ph)
    even = jnp.zeros((ph, oh), jnp.float32).at[p, 2 * p].set(1.0)
    odd = jnp.zeros((ph, oh), jnp.float32).at[p, 2 * p + 1].set(1.0)
    return jnp.stack([even, odd], axis=0)              # (2, OH/2, OH)


def _pool_col_selectors(cout, ow):
    pw = ow // 2
    src = (jnp.arange(cout)[:, None] * ow + 2 * jnp.arange(pw)[None, :]).reshape(-1)
    dst = (jnp.arange(cout)[:, None] * pw + jnp.arange(pw)[None, :]).reshape(-1)
    even = jnp.zeros((cout * ow, cout * pw), jnp.float32).at[src, dst].set(1.0)
    odd = jnp.zeros((cout * ow, cout * pw), jnp.float32).at[src + 1, dst].set(1.0)
    return jnp.stack([even, odd], axis=0)              # (2, Cout*OW, Cout*OW/2)


def prepare_params(params, image_hw=32):
    """Build the kernel-ready (lane-layout-matched, pre-transposed) weights."""
    f32 = jnp.float32
    w1, b1 = params["w1"].astype(f32), params["b1"].astype(f32)
    w2, b2 = params["w2"].astype(f32), params["b2"].astype(f32)
    cout1 = w1.shape[0]
    cout2, _, k2, _ = w2.shape
    ow1 = image_hw - w1.shape[2] + 1     # 28
    pw1 = ow1 // 2                       # 14
    ow2 = pw1 - k2 + 1                   # 10
    pw2 = ow2 // 2                       # 5

    fw1 = params["fw1"].astype(f32)      # (120, Cout2*pw2*pw2), NCHW-flatten order
    nf1 = fw1.shape[0]
    g1 = (fw1.reshape(nf1, cout2, pw2, pw2)
          .transpose(2, 1, 3, 0)                     # (h, c, w, j)
          .reshape(pw2, cout2 * pw2, nf1))           # (5, 80, 120)

    return {
        "t1": _toeplitz_conv(w1, image_hw),
        "b1r": jnp.repeat(b1, ow1)[None, :],
        "p1r": _pool_row_selectors(ow1),
        "p1c": _pool_col_selectors(cout1, ow1),
        "t2": _toeplitz_conv(w2, pw1),
        "b2r": jnp.repeat(b2, ow2)[None, :],
        "p2r": _pool_row_selectors(ow2),
        "p2c": _pool_col_selectors(cout2, ow2),
        "g1": g1,
        "fb1": params["fb1"].astype(f32)[None, :],
        "fw2t": params["fw2"].astype(f32).T,
        "fb2": params["fb2"].astype(f32)[None, :],
        "fw3t": params["fw3"].astype(f32).T,
        "fb3": params["fb3"].astype(f32)[None, :],
    }


_WEIGHT_ORDER = ("t1", "b1r", "p1r", "p1c", "t2", "b2r", "p2r", "p2c",
                 "g1", "fb1", "fw2t", "fb2", "fw3t", "fb3")


# ----------------------------------- forward -------------------------------- #

def _pick_block(n):
    if n >= 16:
        for nb in (8, 4, 2):
            if n % nb == 0:
                return nb
    return 1


def _resident_spec(shape):
    zeros = (0,) * len(shape)
    return pl.BlockSpec(shape, lambda i, _z=zeros: _z)


@jax.jit
def lenet2_forward(x_nchw, kparams):
    n, c, h, w = x_nchw.shape
    nc = kparams["fb3"].shape[1]
    # NCHW -> per-image (H, C*W) lane layout (layout plumbing only).
    x3 = jnp.transpose(x_nchw, (0, 2, 1, 3)).reshape(n, h, c * w)
    nb = _pick_block(n)
    weights = [kparams[k] for k in _WEIGHT_ORDER]

    in_specs = [pl.BlockSpec((nb, h, c * w), lambda i: (i, 0, 0))]
    in_specs += [_resident_spec(a.shape) for a in weights]

    out = pl.pallas_call(
        _lenet2_kernel,
        grid=(n // nb,),
        in_specs=in_specs,
        out_specs=pl.BlockSpec((nb, 1, nc), lambda i: (i, 0, 0)),
        out_shape=jax.ShapeDtypeStruct((n, 1, nc), jnp.float32),
        compiler_params=pltpu.CompilerParams(
            dimension_semantics=("parallel",),
            vmem_limit_bytes=32 * 1024 * 1024),
    )(x3, *weights)
    return out.reshape(n, nc)


# ------------------------------- params & reference ------------------------- #

def init_params(key, num_ch=3, num_classes=10):
    a = 5 if num_ch == 3 else 4
    ks = jax.random.split(key, 10)

    def norm(k, shape, scale):
        return (scale * jax.random.normal(k, shape)).astype(jnp.float32)

    return {
        "w1": norm(ks[0], (6, num_ch, 5, 5), 0.1),
        "b1": norm(ks[1], (6,), 0.1),
        "w2": norm(ks[2], (16, 6, 5, 5), 0.1),
        "b2": norm(ks[3], (16,), 0.1),
        "fw1": norm(ks[4], (120, 16 * a * a), 0.05),
        "fb1": norm(ks[5], (120,), 0.05),
        "fw2": norm(ks[6], (84, 120), 0.05),
        "fb2": norm(ks[7], (84,), 0.05),
        "fw3": norm(ks[8], (num_classes, 84), 0.05),
        "fb3": norm(ks[9], (num_classes,), 0.05),
    }


def ref_forward(x_nchw, params):
    def conv(x, w, b):
        y = lax.conv_general_dilated(
            x, w, window_strides=(1, 1), padding="VALID",
            dimension_numbers=("NCHW", "OIHW", "NCHW"))
        return jax.nn.relu(y + b[None, :, None, None])

    def pool(x):  # NCHW 2x2 max pool
        n, c, h, w = x.shape
        return x.reshape(n, c, h // 2, 2, w // 2, 2).max(axis=(3, 5))

    y = pool(conv(x_nchw, params["w1"], params["b1"]))
    y = pool(conv(y, params["w2"], params["b2"]))
    y = y.reshape(y.shape[0], -1)
    y = jax.nn.relu(y @ params["fw1"].T + params["fb1"])
    y = jax.nn.relu(y @ params["fw2"].T + params["fb2"])
    return y @ params["fw3"].T + params["fb3"]


# ------------------------------------ main ----------------------------------- #

if __name__ == "__main__":
    key = jax.random.PRNGKey(0)
    k_param, k_x = jax.random.split(key)

    params = init_params(k_param, num_ch=3, num_classes=10)
    # num_ch=3 => fc1 expects 16*5*5 features => 32x32 spatial input
    x = jax.random.normal(k_x, (2, 3, 32, 32), dtype=jnp.float32)

    kparams = prepare_params(params, image_hw=32)
    out = jax.block_until_ready(lenet2_forward(x, kparams))
    assert out.shape == (2, 10), out.shape

    ref = jax.block_until_ready(ref_forward(x, params))
    err = float(jnp.max(jnp.abs(out - ref)))
    assert jnp.allclose(out, ref, rtol=1e-3, atol=1e-3), f"max abs err = {err}"

    print("KERNEL_OK")
</pallas_src>

<mosaic_0001>
module attributes {stable_mosaic.version = 11 : i64} {
  func.func @_lenet2_kernel(%arg0: i32, %arg1: memref<1x32x96xf32, #tpu.memory_space<vmem>>, %arg2: memref<5x96x168xf32, #tpu.memory_space<vmem>>, %arg3: memref<1x168xf32, #tpu.memory_space<vmem>>, %arg4: memref<2x14x28xf32, #tpu.memory_space<vmem>>, %arg5: memref<2x168x84xf32, #tpu.memory_space<vmem>>, %arg6: memref<5x84x160xf32, #tpu.memory_space<vmem>>, %arg7: memref<1x160xf32, #tpu.memory_space<vmem>>, %arg8: memref<2x5x10xf32, #tpu.memory_space<vmem>>, %arg9: memref<2x160x80xf32, #tpu.memory_space<vmem>>, %arg10: memref<5x80x120xf32, #tpu.memory_space<vmem>>, %arg11: memref<1x120xf32, #tpu.memory_space<vmem>>, %arg12: memref<120x84xf32, #tpu.memory_space<vmem>>, %arg13: memref<1x84xf32, #tpu.memory_space<vmem>>, %arg14: memref<84x10xf32, #tpu.memory_space<vmem>>, %arg15: memref<1x10xf32, #tpu.memory_space<vmem>>, %arg16: memref<1x1x10xf32, #tpu.memory_space<vmem>>) attributes {dimension_semantics = [#tpu.dimension_semantics<parallel>], iteration_bounds = array<i64: 2>, scalar_prefetch = 0 : i64, scratch_operands = 0 : i64, tpu.core_type = #tpu.core_type<tc>, window_params = [{transform_indices = @transform_0, window_bounds = array<i64: 1, 32, 96>}, {pipeline_mode = #tpu.pipeline_mode<synchronous>, transform_indices = @transform_1, window_bounds = array<i64: 5, 96, 168>}, {pipeline_mode = #tpu.pipeline_mode<synchronous>, transform_indices = @transform_2, window_bounds = array<i64: 1, 168>}, {pipeline_mode = #tpu.pipeline_mode<synchronous>, transform_indices = @transform_3, window_bounds = array<i64: 2, 14, 28>}, {pipeline_mode = #tpu.pipeline_mode<synchronous>, transform_indices = @transform_4, window_bounds = array<i64: 2, 168, 84>}, {pipeline_mode = #tpu.pipeline_mode<synchronous>, transform_indices = @transform_5, window_bounds = array<i64: 5, 84, 160>}, {pipeline_mode = #tpu.pipeline_mode<synchronous>, transform_indices = @transform_6, window_bounds = array<i64: 1, 160>}, {pipeline_mode = #tpu.pipeline_mode<synchronous>, transform_indices = @transform_7, window_bounds = array<i64: 2, 5, 10>}, {pipeline_mode = #tpu.pipeline_mode<synchronous>, transform_indices = @transform_8, window_bounds = array<i64: 2, 160, 80>}, {pipeline_mode = #tpu.pipeline_mode<synchronous>, transform_indices = @transform_9, window_bounds = array<i64: 5, 80, 120>}, {pipeline_mode = #tpu.pipeline_mode<synchronous>, transform_indices = @transform_10, window_bounds = array<i64: 1, 120>}, {pipeline_mode = #tpu.pipeline_mode<synchronous>, transform_indices = @transform_11, window_bounds = array<i64: 120, 84>}, {pipeline_mode = #tpu.pipeline_mode<synchronous>, transform_indices = @transform_12, window_bounds = array<i64: 1, 84>}, {pipeline_mode = #tpu.pipeline_mode<synchronous>, transform_indices = @transform_13, window_bounds = array<i64: 84, 10>}, {pipeline_mode = #tpu.pipeline_mode<synchronous>, transform_indices = @transform_14, window_bounds = array<i64: 1, 10>}, {transform_indices = @transform_15, window_bounds = array<i64: 1, 1, 10>}]} {
    %cst = arith.constant 0.000000e+00 : f32
    %0 = vector.broadcast %cst : f32 to vector<28x168xf32>
    %c0 = arith.constant 0 : index
    %c0_0 = arith.constant 0 : index
    %c0_1 = arith.constant 0 : index
    %1 = vector.load %arg1[%c0, %c0_0, %c0_1] : memref<1x32x96xf32, #tpu.memory_space<vmem>>, vector<1x28x96xf32>
    %2 = vector.shape_cast %1 : vector<1x28x96xf32> to vector<28x96xf32>
    %c0_2 = arith.constant 0 : index
    %c0_3 = arith.constant 0 : index
    %c0_4 = arith.constant 0 : index
    %3 = vector.load %arg2[%c0_2, %c0_3, %c0_4] : memref<5x96x168xf32, #tpu.memory_space<vmem>>, vector<1x96x168xf32>
    %4 = vector.shape_cast %3 : vector<1x96x168xf32> to vector<96x168xf32>
    %cst_5 = arith.constant dense<0.000000e+00> : vector<28x168xf32>
    %5 = tpu.matmul %2, %4, %cst_5 {dimension_numbers = #tpu.dot_dimension_numbers<[1], [0], [0], [1], [0, 0, 1, 1], [], []>} : vector<28x96xf32>, vector<96x168xf32>, vector<28x168xf32> -> vector<28x168xf32>
    %6 = arith.addf %0, %5 : vector<28x168xf32>
    %c0_6 = arith.constant 0 : index
    %c1 = arith.constant 1 : index
    %c0_7 = arith.constant 0 : index
    %7 = vector.load %arg1[%c0_6, %c1, %c0_7] : memref<1x32x96xf32, #tpu.memory_space<vmem>>, vector<1x28x96xf32>
    %8 = vector.shape_cast %7 : vector<1x28x96xf32> to vector<28x96xf32>
    %c1_8 = arith.constant 1 : index
    %c0_9 = arith.constant 0 : index
    %c0_10 = arith.constant 0 : index
    %9 = vector.load %arg2[%c1_8, %c0_9, %c0_10] : memref<5x96x168xf32, #tpu.memory_space<vmem>>, vector<1x96x168xf32>
    %10 = vector.shape_cast %9 : vector<1x96x168xf32> to vector<96x168xf32>
    %cst_11 = arith.constant dense<0.000000e+00> : vector<28x168xf32>
    %11 = tpu.matmul %8, %10, %cst_11 {dimension_numbers = #tpu.dot_dimension_numbers<[1], [0], [0], [1], [0, 0, 1, 1], [], []>} : vector<28x96xf32>, vector<96x168xf32>, vector<28x168xf32> -> vector<28x168xf32>
    %12 = arith.addf %6, %11 : vector<28x168xf32>
    %c0_12 = arith.constant 0 : index
    %c2 = arith.constant 2 : index
    %c0_13 = arith.constant 0 : index
    %13 = vector.load %arg1[%c0_12, %c2, %c0_13] : memref<1x32x96xf32, #tpu.memory_space<vmem>>, vector<1x28x96xf32>
    %14 = vector.shape_cast %13 : vector<1x28x96xf32> to vector<28x96xf32>
    %c2_14 = arith.constant 2 : index
    %c0_15 = arith.constant 0 : index
    %c0_16 = arith.constant 0 : index
    %15 = vector.load %arg2[%c2_14, %c0_15, %c0_16] : memref<5x96x168xf32, #tpu.memory_space<vmem>>, vector<1x96x168xf32>
    %16 = vector.shape_cast %15 : vector<1x96x168xf32> to vector<96x168xf32>
    %cst_17 = arith.constant dense<0.000000e+00> : vector<28x168xf32>
    %17 = tpu.matmul %14, %16, %cst_17 {dimension_numbers = #tpu.dot_dimension_numbers<[1], [0], [0], [1], [0, 0, 1, 1], [], []>} : vector<28x96xf32>, vector<96x168xf32>, vector<28x168xf32> -> vector<28x168xf32>
    %18 = arith.addf %12, %17 : vector<28x168xf32>
    %c0_18 = arith.constant 0 : index
    %c3 = arith.constant 3 : index
    %c0_19 = arith.constant 0 : index
    %19 = vector.load %arg1[%c0_18, %c3, %c0_19] : memref<1x32x96xf32, #tpu.memory_space<vmem>>, vector<1x28x96xf32>
    %20 = vector.shape_cast %19 : vector<1x28x96xf32> to vector<28x96xf32>
    %c3_20 = arith.constant 3 : index
    %c0_21 = arith.constant 0 : index
    %c0_22 = arith.constant 0 : index
    %21 = vector.load %arg2[%c3_20, %c0_21, %c0_22] : memref<5x96x168xf32, #tpu.memory_space<vmem>>, vector<1x96x168xf32>
    %22 = vector.shape_cast %21 : vector<1x96x168xf32> to vector<96x168xf32>
    %cst_23 = arith.constant dense<0.000000e+00> : vector<28x168xf32>
    %23 = tpu.matmul %20, %22, %cst_23 {dimension_numbers = #tpu.dot_dimension_numbers<[1], [0], [0], [1], [0, 0, 1, 1], [], []>} : vector<28x96xf32>, vector<96x168xf32>, vector<28x168xf32> -> vector<28x168xf32>
    %24 = arith.addf %18, %23 : vector<28x168xf32>
    %c0_24 = arith.constant 0 : index
    %c4 = arith.constant 4 : index
    %c0_25 = arith.constant 0 : index
    %25 = vector.load %arg1[%c0_24, %c4, %c0_25] : memref<1x32x96xf32, #tpu.memory_space<vmem>>, vector<1x28x96xf32>
    %26 = vector.shape_cast %25 : vector<1x28x96xf32> to vector<28x96xf32>
    %c4_26 = arith.constant 4 : index
    %c0_27 = arith.constant 0 : index
    %c0_28 = arith.constant 0 : index
    %27 = vector.load %arg2[%c4_26, %c0_27, %c0_28] : memref<5x96x168xf32, #tpu.memory_space<vmem>>, vector<1x96x168xf32>
    %28 = vector.shape_cast %27 : vector<1x96x168xf32> to vector<96x168xf32>
    %cst_29 = arith.constant dense<0.000000e+00> : vector<28x168xf32>
    %29 = tpu.matmul %26, %28, %cst_29 {dimension_numbers = #tpu.dot_dimension_numbers<[1], [0], [0], [1], [0, 0, 1, 1], [], []>} : vector<28x96xf32>, vector<96x168xf32>, vector<28x168xf32> -> vector<28x168xf32>
    %30 = arith.addf %24, %29 : vector<28x168xf32>
    %c0_30 = arith.constant 0 : index
    %c0_31 = arith.constant 0 : index
    %31 = vector.load %arg3[%c0_30, %c0_31] : memref<1x168xf32, #tpu.memory_space<vmem>>, vector<1x168xf32>
    %32 = vector.broadcast %31 : vector<1x168xf32> to vector<28x168xf32>
    %33 = arith.addf %30, %32 : vector<28x168xf32>
    %cst_32 = arith.constant 0.000000e+00 : f32
    %34 = vector.broadcast %cst_32 : f32 to vector<28x168xf32>
    %35 = arith.maximumf %33, %34 : vector<28x168xf32>
    %c0_33 = arith.constant 0 : index
    %c0_34 = arith.constant 0 : index
    %c0_35 = arith.constant 0 : index
    %36 = vector.load %arg4[%c0_33, %c0_34, %c0_35] : memref<2x14x28xf32, #tpu.memory_space<vmem>>, vector<1x14x28xf32>
    %37 = vector.shape_cast %36 : vector<1x14x28xf32> to vector<14x28xf32>
    %cst_36 = arith.constant dense<0.000000e+00> : vector<14x168xf32>
    %38 = tpu.matmul %37, %35, %cst_36 {dimension_numbers = #tpu.dot_dimension_numbers<[1], [0], [0], [1], [0, 0, 1, 1], [], []>} : vector<14x28xf32>, vector<28x168xf32>, vector<14x168xf32> -> vector<14x168xf32>
    %c1_37 = arith.constant 1 : index
    %c0_38 = arith.constant 0 : index
    %c0_39 = arith.constant 0 : index
    %39 = vector.load %arg4[%c1_37, %c0_38, %c0_39] : memref<2x14x28xf32, #tpu.memory_space<vmem>>, vector<1x14x28xf32>
    %40 = vector.shape_cast %39 : vector<1x14x28xf32> to vector<14x28xf32>
    %cst_40 = arith.constant dense<0.000000e+00> : vector<14x168xf32>
    %41 = tpu.matmul %40, %35, %cst_40 {dimension_numbers = #tpu.dot_dimension_numbers<[1], [0], [0], [1], [0, 0, 1, 1], [], []>} : vector<14x28xf32>, vector<28x168xf32>, vector<14x168xf32> -> vector<14x168xf32>
    %42 = arith.maximumf %38, %41 : vector<14x168xf32>
    %c0_41 = arith.constant 0 : index
    %c0_42 = arith.constant 0 : index
    %c0_43 = arith.constant 0 : index
    %43 = vector.load %arg5[%c0_41, %c0_42, %c0_43] : memref<2x168x84xf32, #tpu.memory_space<vmem>>, vector<1x168x84xf32>
    %44 = vector.shape_cast %43 : vector<1x168x84xf32> to vector<168x84xf32>
    %cst_44 = arith.constant dense<0.000000e+00> : vector<14x84xf32>
    %45 = tpu.matmul %42, %44, %cst_44 {dimension_numbers = #tpu.dot_dimension_numbers<[1], [0], [0], [1], [0, 0, 1, 1], [], []>} : vector<14x168xf32>, vector<168x84xf32>, vector<14x84xf32> -> vector<14x84xf32>
    %c1_45 = arith.constant 1 : index
    %c0_46 = arith.constant 0 : index
    %c0_47 = arith.constant 0 : index
    %46 = vector.load %arg5[%c1_45, %c0_46, %c0_47] : memref<2x168x84xf32, #tpu.memory_space<vmem>>, vector<1x168x84xf32>
    %47 = vector.shape_cast %46 : vector<1x168x84xf32> to vector<168x84xf32>
    %cst_48 = arith.constant dense<0.000000e+00> : vector<14x84xf32>
    %48 = tpu.matmul %42, %47, %cst_48 {dimension_numbers = #tpu.dot_dimension_numbers<[1], [0], [0], [1], [0, 0, 1, 1], [], []>} : vector<14x168xf32>, vector<168x84xf32>, vector<14x84xf32> -> vector<14x84xf32>
    %49 = arith.maximumf %45, %48 : vector<14x84xf32>
    %cst_49 = arith.constant 0.000000e+00 : f32
    %50 = vector.broadcast %cst_49 : f32 to vector<10x160xf32>
    %51 = vector.extract_strided_slice %49 {offsets = [0, 0], sizes = [10, 84], strides = [1, 1]} : vector<14x84xf32> to vector<10x84xf32>
    %c0_50 = arith.constant 0 : index
    %c0_51 = arith.constant 0 : index
    %c0_52 = arith.constant 0 : index
    %52 = vector.load %arg6[%c0_50, %c0_51, %c0_52] : memref<5x84x160xf32, #tpu.memory_space<vmem>>, vector<1x84x160xf32>
    %53 = vector.shape_cast %52 : vector<1x84x160xf32> to vector<84x160xf32>
    %cst_53 = arith.constant dense<0.000000e+00> : vector<10x160xf32>
    %54 = tpu.matmul %51, %53, %cst_53 {dimension_numbers = #tpu.dot_dimension_numbers<[1], [0], [0], [1], [0, 0, 1, 1], [], []>} : vector<10x84xf32>, vector<84x160xf32>, vector<10x160xf32> -> vector<10x160xf32>
    %55 = arith.addf %50, %54 : vector<10x160xf32>
    %56 = vector.extract_strided_slice %49 {offsets = [1, 0], sizes = [10, 84], strides = [1, 1]} : vector<14x84xf32> to vector<10x84xf32>
    %c1_54 = arith.constant 1 : index
    %c0_55 = arith.constant 0 : index
    %c0_56 = arith.constant 0 : index
    %57 = vector.load %arg6[%c1_54, %c0_55, %c0_56] : memref<5x84x160xf32, #tpu.memory_space<vmem>>, vector<1x84x160xf32>
    %58 = vector.shape_cast %57 : vector<1x84x160xf32> to vector<84x160xf32>
    %cst_57 = arith.constant dense<0.000000e+00> : vector<10x160xf32>
    %59 = tpu.matmul %56, %58, %cst_57 {dimension_numbers = #tpu.dot_dimension_numbers<[1], [0], [0], [1], [0, 0, 1, 1], [], []>} : vector<10x84xf32>, vector<84x160xf32>, vector<10x160xf32> -> vector<10x160xf32>
    %60 = arith.addf %55, %59 : vector<10x160xf32>
    %61 = vector.extract_strided_slice %49 {offsets = [2, 0], sizes = [10, 84], strides = [1, 1]} : vector<14x84xf32> to vector<10x84xf32>
    %c2_58 = arith.constant 2 : index
    %c0_59 = arith.constant 0 : index
    %c0_60 = arith.constant 0 : index
    %62 = vector.load %arg6[%c2_58, %c0_59, %c0_60] : memref<5x84x160xf32, #tpu.memory_space<vmem>>, vector<1x84x160xf32>
    %63 = vector.shape_cast %62 : vector<1x84x160xf32> to vector<84x160xf32>
    %cst_61 = arith.constant dense<0.000000e+00> : vector<10x160xf32>
    %64 = tpu.matmul %61, %63, %cst_61 {dimension_numbers = #tpu.dot_dimension_numbers<[1], [0], [0], [1], [0, 0, 1, 1], [], []>} : vector<10x84xf32>, vector<84x160xf32>, vector<10x160xf32> -> vector<10x160xf32>
    %65 = arith.addf %60, %64 : vector<10x160xf32>
    %66 = vector.extract_strided_slice %49 {offsets = [3, 0], sizes = [10, 84], strides = [1, 1]} : vector<14x84xf32> to vector<10x84xf32>
    %c3_62 = arith.constant 3 : index
    %c0_63 = arith.constant 0 : index
    %c0_64 = arith.constant 0 : index
    %67 = vector.load %arg6[%c3_62, %c0_63, %c0_64] : memref<5x84x160xf32, #tpu.memory_space<vmem>>, vector<1x84x160xf32>
    %68 = vector.shape_cast %67 : vector<1x84x160xf32> to vector<84x160xf32>
    %cst_65 = arith.constant dense<0.000000e+00> : vector<10x160xf32>
    %69 = tpu.matmul %66, %68, %cst_65 {dimension_numbers = #tpu.dot_dimension_numbers<[1], [0], [0], [1], [0, 0, 1, 1], [], []>} : vector<10x84xf32>, vector<84x160xf32>, vector<10x160xf32> -> vector<10x160xf32>
    %70 = arith.addf %65, %69 : vector<10x160xf32>
    %71 = vector.extract_strided_slice %49 {offsets = [4, 0], sizes = [10, 84], strides = [1, 1]} : vector<14x84xf32> to vector<10x84xf32>
    %c4_66 = arith.constant 4 : index
    %c0_67 = arith.constant 0 : index
    %c0_68 = arith.constant 0 : index
    %72 = vector.load %arg6[%c4_66, %c0_67, %c0_68] : memref<5x84x160xf32, #tpu.memory_space<vmem>>, vector<1x84x160xf32>
    %73 = vector.shape_cast %72 : vector<1x84x160xf32> to vector<84x160xf32>
    %cst_69 = arith.constant dense<0.000000e+00> : vector<10x160xf32>
    %74 = tpu.matmul %71, %73, %cst_69 {dimension_numbers = #tpu.dot_dimension_numbers<[1], [0], [0], [1], [0, 0, 1, 1], [], []>} : vector<10x84xf32>, vector<84x160xf32>, vector<10x160xf32> -> vector<10x160xf32>
    %75 = arith.addf %70, %74 : vector<10x160xf32>
    %c0_70 = arith.constant 0 : index
    %c0_71 = arith.constant 0 : index
    %76 = vector.load %arg7[%c0_70, %c0_71] : memref<1x160xf32, #tpu.memory_space<vmem>>, vector<1x160xf32>
    %77 = vector.broadcast %76 : vector<1x160xf32> to vector<10x160xf32>
    %78 = arith.addf %75, %77 : vector<10x160xf32>
    %cst_72 = arith.constant 0.000000e+00 : f32
    %79 = vector.broadcast %cst_72 : f32 to vector<10x160xf32>
    %80 = arith.maximumf %78, %79 : vector<10x160xf32>
    %c0_73 = arith.constant 0 : index
    %c0_74 = arith.constant 0 : index
    %c0_75 = arith.constant 0 : index
    %81 = vector.load %arg8[%c0_73, %c0_74, %c0_75] : memref<2x5x10xf32, #tpu.memory_space<vmem>>, vector<1x5x10xf32>
    %82 = vector.shape_cast %81 : vector<1x5x10xf32> to vector<5x10xf32>
    %cst_76 = arith.constant dense<0.000000e+00> : vector<5x160xf32>
    %83 = tpu.matmul %82, %80, %cst_76 {dimension_numbers = #tpu.dot_dimension_numbers<[1], [0], [0], [1], [0, 0, 1, 1], [], []>} : vector<5x10xf32>, vector<10x160xf32>, vector<5x160xf32> -> vector<5x160xf32>
    %c1_77 = arith.constant 1 : index
    %c0_78 = arith.constant 0 : index
    %c0_79 = arith.constant 0 : index
    %84 = vector.load %arg8[%c1_77, %c0_78, %c0_79] : memref<2x5x10xf32, #tpu.memory_space<vmem>>, vector<1x5x10xf32>
    %85 = vector.shape_cast %84 : vector<1x5x10xf32> to vector<5x10xf32>
    %cst_80 = arith.constant dense<0.000000e+00> : vector<5x160xf32>
    %86 = tpu.matmul %85, %80, %cst_80 {dimension_numbers = #tpu.dot_dimension_numbers<[1], [0], [0], [1], [0, 0, 1, 1], [], []>} : vector<5x10xf32>, vector<10x160xf32>, vector<5x160xf32> -> vector<5x160xf32>
    %87 = arith.maximumf %83, %86 : vector<5x160xf32>
    %c0_81 = arith.constant 0 : index
    %c0_82 = arith.constant 0 : index
    %c0_83 = arith.constant 0 : index
    %88 = vector.load %arg9[%c0_81, %c0_82, %c0_83] : memref<2x160x80xf32, #tpu.memory_space<vmem>>, vector<1x160x80xf32>
    %89 = vector.shape_cast %88 : vector<1x160x80xf32> to vector<160x80xf32>
    %cst_84 = arith.constant dense<0.000000e+00> : vector<5x80xf32>
    %90 = tpu.matmul %87, %89, %cst_84 {dimension_numbers = #tpu.dot_dimension_numbers<[1], [0], [0], [1], [0, 0, 1, 1], [], []>} : vector<5x160xf32>, vector<160x80xf32>, vector<5x80xf32> -> vector<5x80xf32>
    %c1_85 = arith.constant 1 : index
    %c0_86 = arith.constant 0 : index
    %c0_87 = arith.constant 0 : index
    %91 = vector.load %arg9[%c1_85, %c0_86, %c0_87] : memref<2x160x80xf32, #tpu.memory_space<vmem>>, vector<1x160x80xf32>
    %92 = vector.shape_cast %91 : vector<1x160x80xf32> to vector<160x80xf32>
    %cst_88 = arith.constant dense<0.000000e+00> : vector<5x80xf32>
    %93 = tpu.matmul %87, %92, %cst_88 {dimension_numbers = #tpu.dot_dimension_numbers<[1], [0], [0], [1], [0, 0, 1, 1], [], []>} : vector<5x160xf32>, vector<160x80xf32>, vector<5x80xf32> -> vector<5x80xf32>
    %94 = arith.maximumf %90, %93 : vector<5x80xf32>
    %c0_89 = arith.constant 0 : index
    %c0_90 = arith.constant 0 : index
    %95 = vector.load %arg11[%c0_89, %c0_90] : memref<1x120xf32, #tpu.memory_space<vmem>>, vector<1x120xf32>
    %96 = vector.extract_strided_slice %94 {offsets = [0, 0], sizes = [1, 80], strides = [1, 1]} : vector<5x80xf32> to vector<1x80xf32>
    %c0_91 = arith.constant 0 : index
    %c0_92 = arith.constant 0 : index
    %c0_93 = arith.constant 0 : index
    %97 = vector.load %arg10[%c0_91, %c0_92, %c0_93] : memref<5x80x120xf32, #tpu.memory_space<vmem>>, vector<1x80x120xf32>
    %98 = vector.shape_cast %97 : vector<1x80x120xf32> to vector<80x120xf32>
    %cst_94 = arith.constant dense<0.000000e+00> : vector<1x120xf32>
    %99 = tpu.matmul %96, %98, %cst_94 {dimension_numbers = #tpu.dot_dimension_numbers<[1], [0], [0], [1], [0, 0, 1, 1], [], []>} : vector<1x80xf32>, vector<80x120xf32>, vector<1x120xf32> -> vector<1x120xf32>
    %100 = arith.addf %95, %99 : vector<1x120xf32>
    %101 = vector.extract_strided_slice %94 {offsets = [1, 0], sizes = [1, 80], strides = [1, 1]} : vector<5x80xf32> to vector<1x80xf32>
    %c1_95 = arith.constant 1 : index
    %c0_96 = arith.constant 0 : index
    %c0_97 = arith.constant 0 : index
    %102 = vector.load %arg10[%c1_95, %c0_96, %c0_97] : memref<5x80x120xf32, #tpu.memory_space<vmem>>, vector<1x80x120xf32>
    %103 = vector.shape_cast %102 : vector<1x80x120xf32> to vector<80x120xf32>
    %cst_98 = arith.constant dense<0.000000e+00> : vector<1x120xf32>
    %104 = tpu.matmul %101, %103, %cst_98 {dimension_numbers = #tpu.dot_dimension_numbers<[1], [0], [0], [1], [0, 0, 1, 1], [], []>} : vector<1x80xf32>, vector<80x120xf32>, vector<1x120xf32> -> vector<1x120xf32>
    %105 = arith.addf %100, %104 : vector<1x120xf32>
    %106 = vector.extract_strided_slice %94 {offsets = [2, 0], sizes = [1, 80], strides = [1, 1]} : vector<5x80xf32> to vector<1x80xf32>
    %c2_99 = arith.constant 2 : index
    %c0_100 = arith.constant 0 : index
    %c0_101 = arith.constant 0 : index
    %107 = vector.load %arg10[%c2_99, %c0_100, %c0_101] : memref<5x80x120xf32, #tpu.memory_space<vmem>>, vector<1x80x120xf32>
    %108 = vector.shape_cast %107 : vector<1x80x120xf32> to vector<80x120xf32>
    %cst_102 = arith.constant dense<0.000000e+00> : vector<1x120xf32>
    %109 = tpu.matmul %106, %108, %cst_102 {dimension_numbers = #tpu.dot_dimension_numbers<[1], [0], [0], [1], [0, 0, 1, 1], [], []>} : vector<1x80xf32>, vector<80x120xf32>, vector<1x120xf32> -> vector<1x120xf32>
    %110 = arith.addf %105, %109 : vector<1x120xf32>
    %111 = vector.extract_strided_slice %94 {offsets = [3, 0], sizes = [1, 80], strides = [1, 1]} : vector<5x80xf32> to vector<1x80xf32>
    %c3_103 = arith.constant 3 : index
    %c0_104 = arith.constant 0 : index
    %c0_105 = arith.constant 0 : index
    %112 = vector.load %arg10[%c3_103, %c0_104, %c0_105] : memref<5x80x120xf32, #tpu.memory_space<vmem>>, vector<1x80x120xf32>
    %113 = vector.shape_cast %112 : vector<1x80x120xf32> to vector<80x120xf32>
    %cst_106 = arith.constant dense<0.000000e+00> : vector<1x120xf32>
    %114 = tpu.matmul %111, %113, %cst_106 {dimension_numbers = #tpu.dot_dimension_numbers<[1], [0], [0], [1], [0, 0, 1, 1], [], []>} : vector<1x80xf32>, vector<80x120xf32>, vector<1x120xf32> -> vector<1x120xf32>
    %115 = arith.addf %110, %114 : vector<1x120xf32>
    %116 = vector.extract_strided_slice %94 {offsets = [4, 0], sizes = [1, 80], strides = [1, 1]} : vector<5x80xf32> to vector<1x80xf32>
    %c4_107 = arith.constant 4 : index
    %c0_108 = arith.constant 0 : index
    %c0_109 = arith.constant 0 : index
    %117 = vector.load %arg10[%c4_107, %c0_108, %c0_109] : memref<5x80x120xf32, #tpu.memory_space<vmem>>, vector<1x80x120xf32>
    %118 = vector.shape_cast %117 : vector<1x80x120xf32> to vector<80x120xf32>
    %cst_110 = arith.constant dense<0.000000e+00> : vector<1x120xf32>
    %119 = tpu.matmul %116, %118, %cst_110 {dimension_numbers = #tpu.dot_dimension_numbers<[1], [0], [0], [1], [0, 0, 1, 1], [], []>} : vector<1x80xf32>, vector<80x120xf32>, vector<1x120xf32> -> vector<1x120xf32>
    %120 = arith.addf %115, %119 : vector<1x120xf32>
    %cst_111 = arith.constant 0.000000e+00 : f32
    %121 = vector.broadcast %cst_111 : f32 to vector<1x120xf32>
    %122 = arith.maximumf %120, %121 : vector<1x120xf32>
    %c0_112 = arith.constant 0 : index
    %c0_113 = arith.constant 0 : index
    %123 = vector.load %arg12[%c0_112, %c0_113] : memref<120x84xf32, #tpu.memory_space<vmem>>, vector<120x84xf32>
    %cst_114 = arith.constant dense<0.000000e+00> : vector<1x84xf32>
    %124 = tpu.matmul %122, %123, %cst_114 {dimension_numbers = #tpu.dot_dimension_numbers<[1], [0], [0], [1], [0, 0, 1, 1], [], []>} : vector<1x120xf32>, vector<120x84xf32>, vector<1x84xf32> -> vector<1x84xf32>
    %c0_115 = arith.constant 0 : index
    %c0_116 = arith.constant 0 : index
    %125 = vector.load %arg13[%c0_115, %c0_116] : memref<1x84xf32, #tpu.memory_space<vmem>>, vector<1x84xf32>
    %126 = arith.addf %124, %125 : vector<1x84xf32>
    %cst_117 = arith.constant 0.000000e+00 : f32
    %127 = vector.broadcast %cst_117 : f32 to vector<1x84xf32>
    %128 = arith.maximumf %126, %127 : vector<1x84xf32>
    %c0_118 = arith.constant 0 : index
    %c0_119 = arith.constant 0 : index
    %129 = vector.load %arg14[%c0_118, %c0_119] : memref<84x10xf32, #tpu.memory_space<vmem>>, vector<84x10xf32>
    %cst_120 = arith.constant dense<0.000000e+00> : vector<1x10xf32>
    %130 = tpu.matmul %128, %129, %cst_120 {dimension_numbers = #tpu.dot_dimension_numbers<[1], [0], [0], [1], [0, 0, 1, 1], [], []>} : vector<1x84xf32>, vector<84x10xf32>, vector<1x10xf32> -> vector<1x10xf32>
    %c0_121 = arith.constant 0 : index
    %c0_122 = arith.constant 0 : index
    %131 = vector.load %arg15[%c0_121, %c0_122] : memref<1x10xf32, #tpu.memory_space<vmem>>, vector<1x10xf32>
    %132 = arith.addf %130, %131 : vector<1x10xf32>
    %c0_123 = arith.constant 0 : index
    %c0_124 = arith.constant 0 : index
    %c0_125 = arith.constant 0 : index
    %133 = vector.load %arg16[%c0_123, %c0_124, %c0_125] : memref<1x1x10xf32, #tpu.memory_space<vmem>>, vector<1x1x10xf32>
    %134 = vector.shape_cast %133 : vector<1x1x10xf32> to vector<1x10xf32>
    %135 = vector.shape_cast %132 : vector<1x10xf32> to vector<1x1x10xf32>
    tpu.vector_store %arg16[%c0_123, %c0_124, %c0_125], %135 {strides = array<i32>} : memref<1x1x10xf32, #tpu.memory_space<vmem>>, vector<1x1x10xf32>,
    return
  }
  func.func @transform_0(%arg0: i32) -> (i32, i32, i32) {
    %c0_i32 = arith.constant 0 : i32
    %c0_i32_0 = arith.constant 0 : i32
    %c0_i32_1 = arith.constant 0 : i32
    return %arg0, %c0_i32, %c0_i32_0 : i32, i32, i32
  }
  func.func @transform_1(%arg0: i32) -> (i32, i32, i32) {
    %c0_i32 = arith.constant 0 : i32
    %c0_i32_0 = arith.constant 0 : i32
    %c0_i32_1 = arith.constant 0 : i32
    %c0_i32_2 = arith.constant 0 : i32
    return %c0_i32, %c0_i32_0, %c0_i32_1 : i32, i32, i32
  }
  func.func @transform_2(%arg0: i32) -> (i32, i32) {
    %c0_i32 = arith.constant 0 : i32
    %c0_i32_0 = arith.constant 0 : i32
    %c0_i32_1 = arith.constant 0 : i32
    return %c0_i32, %c0_i32_0 : i32, i32
  }
  func.func @transform_3(%arg0: i32) -> (i32, i32, i32) {
    %c0_i32 = arith.constant 0 : i32
    %c0_i32_0 = arith.constant 0 : i32
    %c0_i32_1 = arith.constant 0 : i32
    %c0_i32_2 = arith.constant 0 : i32
    return %c0_i32, %c0_i32_0, %c0_i32_1 : i32, i32, i32
  }
  func.func @transform_4(%arg0: i32) -> (i32, i32, i32) {
    %c0_i32 = arith.constant 0 : i32
    %c0_i32_0 = arith.constant 0 : i32
    %c0_i32_1 = arith.constant 0 : i32
    %c0_i32_2 = arith.constant 0 : i32
    return %c0_i32, %c0_i32_0, %c0_i32_1 : i32, i32, i32
  }
  func.func @transform_5(%arg0: i32) -> (i32, i32, i32) {
    %c0_i32 = arith.constant 0 : i32
    %c0_i32_0 = arith.constant 0 : i32
    %c0_i32_1 = arith.constant 0 : i32
    %c0_i32_2 = arith.constant 0 : i32
    return %c0_i32, %c0_i32_0, %c0_i32_1 : i32, i32, i32
  }
  func.func @transform_6(%arg0: i32) -> (i32, i32) {
    %c0_i32 = arith.constant 0 : i32
    %c0_i32_0 = arith.constant 0 : i32
    %c0_i32_1 = arith.constant 0 : i32
    return %c0_i32, %c0_i32_0 : i32, i32
  }
  func.func @transform_7(%arg0: i32) -> (i32, i32, i32) {
    %c0_i32 = arith.constant 0 : i32
    %c0_i32_0 = arith.constant 0 : i32
    %c0_i32_1 = arith.constant 0 : i32
    %c0_i32_2 = arith.constant 0 : i32
    return %c0_i32, %c0_i32_0, %c0_i32_1 : i32, i32, i32
  }
  func.func @transform_8(%arg0: i32) -> (i32, i32, i32) {
    %c0_i32 = arith.constant 0 : i32
    %c0_i32_0 = arith.constant 0 : i32
    %c0_i32_1 = arith.constant 0 : i32
    %c0_i32_2 = arith.constant 0 : i32
    return %c0_i32, %c0_i32_0, %c0_i32_1 : i32, i32, i32
  }
  func.func @transform_9(%arg0: i32) -> (i32, i32, i32) {
    %c0_i32 = arith.constant 0 : i32
    %c0_i32_0 = arith.constant 0 : i32
    %c0_i32_1 = arith.constant 0 : i32
    %c0_i32_2 = arith.constant 0 : i32
    return %c0_i32, %c0_i32_0, %c0_i32_1 : i32, i32, i32
  }
  func.func @transform_10(%arg0: i32) -> (i32, i32) {
    %c0_i32 = arith.constant 0 : i32
    %c0_i32_0 = arith.constant 0 : i32
    %c0_i32_1 = arith.constant 0 : i32
    return %c0_i32, %c0_i32_0 : i32, i32
  }
  func.func @transform_11(%arg0: i32) -> (i32, i32) {
    %c0_i32 = arith.constant 0 : i32
    %c0_i32_0 = arith.constant 0 : i32
    %c0_i32_1 = arith.constant 0 : i32
    return %c0_i32, %c0_i32_0 : i32, i32
  }
  func.func @transform_12(%arg0: i32) -> (i32, i32) {
    %c0_i32 = arith.constant 0 : i32
    %c0_i32_0 = arith.constant 0 : i32
    %c0_i32_1 = arith.constant 0 : i32
    return %c0_i32, %c0_i32_0 : i32, i32
  }
  func.func @transform_13(%arg0: i32) -> (i32, i32) {
    %c0_i32 = arith.constant 0 : i32
    %c0_i32_0 = arith.constant 0 : i32
    %c0_i32_1 = arith.constant 0 : i32
    return %c0_i32, %c0_i32_0 : i32, i32
  }
  func.func @transform_14(%arg0: i32) -> (i32, i32) {
    %c0_i32 = arith.constant 0 : i32
    %c0_i32_0 = arith.constant 0 : i32
    %c0_i32_1 = arith.constant 0 : i32
    return %c0_i32, %c0_i32_0 : i32, i32
  }
  func.func @transform_15(%arg0: i32) -> (i32, i32, i32) {
    %c0_i32 = arith.constant 0 : i32
    %c0_i32_0 = arith.constant 0 : i32
    %c0_i32_1 = arith.constant 0 : i32
    return %arg0, %c0_i32, %c0_i32_0 : i32, i32, i32
  }
}

</mosaic_0001>

<bundles_post_ra>
// kernel: lenet2_forward.1
= control target key start
LH: loop header
LB: loop body
LE: loop exit
PB: predicated region body
PF: predicated region fallthrough
CT: control target
= control target key end

     0   :  { %20 = vsyncpa [#allocation3], 0  ;;  %s6087_s0 = inlined_call_operand.vmem [shape: f32[2,32,96], index: 0, kind: input, shape index: {}]   ;;  %s6088_s1 = inlined_call_operand.vmem [shape: f32[5,96,168], index: 1, kind: input, shape index: {}]   ;;  %s6089_s2 = inlined_call_operand.vmem [shape: f32[1,168], index: 2, kind: input, shape index: {}]   ;;  %s6090_s3 = inlined_call_operand.vmem [shape: f32[2,14,28], index: 3, kind: input, shape index: {}]   ;;  %s6091_s4 = inlined_call_operand.vmem [shape: f32[2,168,84], index: 4, kind: input, shape index: {}]   ;;  %s6092_s5 = inlined_call_operand.vmem [shape: f32[5,84,160], index: 5, kind: input, shape index: {}]   ;;  %s6093_s6 = inlined_call_operand.vmem [shape: f32[1,160], index: 6, kind: input, shape index: {}]   ;;  %s6094_s7 = inlined_call_operand.vmem [shape: f32[2,5,10], index: 7, kind: input, shape index: {}]   ;;  %s6095_s8 = inlined_call_operand.vmem [shape: f32[2,160,80], index: 8, kind: input, shape index: {}]   ;;  %s6096_s9 = inlined_call_operand.vmem [shape: f32[5,80,120], index: 9, kind: input, shape index: {}]   ;;  %s6097_s10 = inlined_call_operand.vmem [shape: f32[1,120], index: 10, kind: input, shape index: {}]   ;;  %s6098_s11 = inlined_call_operand.vmem [shape: f32[120,84], index: 11, kind: input, shape index: {}]   ;;  %s6099_s12 = inlined_call_operand.vmem [shape: f32[1,84], index: 12, kind: input, shape index: {}]   ;;  %s6100_s13 = inlined_call_operand.vmem [shape: f32[84,10], index: 13, kind: input, shape index: {}]   ;;  %s6101_s14 = inlined_call_operand.vmem [shape: f32[1,10], index: 14, kind: input, shape index: {}]   ;;  %s6102_s15 = inlined_call_operand.hbm [shape: f32[2,1,10], index: 15, kind: output, shape index: {}]  }
   0x1   :  { %22 = vsyncpa [#allocation3 + $0x1], 0  ;;  %s4535_s18 = smov 0   ;;  %s4537_s19 = smov 0  }
   0x2   :  { %s4539_s20 = smov 0   ;;  %s4541_s21 = smov 0  }
   0x3 LB: > { %6109 = sst [smem:[#allocation5_spill]] %s4436_s18  ;;  %s4556_s22 = sadd.s32 4294967295, %s4448_s21   ;;  %s4448_s21 = sphi %s4541_s21, %s6120_s21   ;;  %s4444_s20 = sphi %s4539_s20, %s6122_s20   ;;  %s4440_s19 = sphi %s4537_s19, %s6124_s19   ;;  %s4436_s18 = sphi %s4535_s18, %s6123_s18  }
   0x4   : > { %6110 = sst [smem:[#allocation6_spill]] %s4444_s20  ;;  %s3201_s23 = sadd.s32 4294967294, %s4448_s21  }
   0x5   : > { %6111 = sst [smem:[#allocation7_spill]] %s4448_s21  ;;  %s4560_s24 = sadd.s32 1, %s4448_s21  }
   0x6   : > { %6112 = sst [smem:[#allocation8_spill]] %s4560_s24  ;;  %s355_s25 = sadd.s32 1, %s4444_s20 }
   0x7   : > { %s352_s26 = ssub.s32 %s4448_s21, %s4560_s24  ;;  %p365_p0 = scmp.ne.s32.totalorder %s4444_s20, %s4440_s19 }
   0x8   : > { %p353_p1 = scmp.eq.s32.totalorder %s352_s26, 0  ;;  %p366_p2 = scmp.eq.s32.totalorder %s4556_s22, 1 }
   0x9   : > { %p371_p3 = scmp.ne.s32.totalorder %s4440_s19, %s4436_s18  ;;  %p372_p4 = scmp.eq.s32.totalorder %s3201_s23, 1 }
   0xa   : > { %s4571_s27 = scalar_select %p353_p1, %s4444_s20, %s355_s25  }
   0xb   : > { %p4573_p5 = por %p366_p2, %p365_p0  ;;  %p4577_p6 = por %p372_p4, %p371_p3 }
   0xc   : > { %6113 = sst [smem:[#allocation9_spill]] %s4571_s27  ;;  %p3204_p7 = scmp.ge.s32.totalorder %s4448_s21, 1 }
   0xd   : > { %s6115_s29 = scalar_select %p4577_p6, 1, 0 }
   0xe   : > { %p440_p8 = scmp.lt.s32.totalorder %s4448_s21, 3 }
   0xf   : > { %6116 = sst [smem:[#allocation10_spill]] %s6115_s29 }
  0x10   : > { %p441_p9 = pnand %p3204_p7, %p440_p8 }
  0x11   : > { %v3208_v0 = vld [vmem:[%s6088_s1 + $0xc8] sm:$0xff] (!%p441_p9)  ;;  %v3210_v1 = vld [vmem:[%s6088_s1 + $0xd8] sm:$0xff] (!%p441_p9)  ;;  %v3207_v2 = vld [vmem:[%s6088_s1 + $0xc0] sm:$0xff] (!%p441_p9)  ;;  %v4450_v7 = vmov (!%p441_p9), 0.0   ;;  %p487_p10 = scmp.lt.s32.totalorder (!%p441_p9), %s4556_s22, 1  ;;  %vm549_vm0 = vcmask (!%p441_p9), 785408  }
  0x12   : > { %444 = sbr.rel (%p441_p9) target bundleno = 2364 (0x93c), region = 80  ;;  %v3803_v3 = vpack.c.bf16 (!%p441_p9), %v3210_v1, %v3208_v0  ;;  %v3209_v4 = vld [vmem:[%s6088_s1 + $0xd0] sm:$0xff] (!%p441_p9)  ;;  %v3212_v5 = vld [vmem:[%s6088_s1 + $0xe8] sm:$0xff] (!%p441_p9)  ;;  %v3214_v6 = vld [vmem:[%s6088_s1 + $0xf8] sm:$0xff] (!%p441_p9)  ;;  %626 = vmatprep.mubr.f32.mxu0 (!%p441_p9), %v4450_v7  ;;  %1274 = vmatprep.mubr.f32.mxu1 (!%p441_p9), %v4450_v7  ;;  %vm1203_vm1 = vcmask (!%p441_p9), 1043456   ;;  %vm4451_vm2 = vmmov (!%p441_p9), 1  }
  0x13   : > { %v3805_v8 = vpack.c.bf16 (!%p441_p9), %v3209_v4, %v3207_v2  ;;  %v3807_v9 = vpack.c.bf16 (!%p441_p9), %v3214_v6, %v3212_v5  ;;  %v3211_v10 = vld [vmem:[%s6088_s1 + $0xe0] sm:$0xff] (!%p441_p9)  ;;  %v3213_v11 = vld [vmem:[%s6088_s1 + $0xf0] sm:$0xff] (!%p441_p9)  ;;  %v3216_v12 = vld [vmem:[%s6088_s1 + $0x108] sm:$0xff] (!%p441_p9)  ;;  %vm1196_vm4 = vcmask (!%p441_p9), 228352   ;;  %vm1398_vm5 = vcmask (!%p441_p9), 326656   ;;  %s485_s29 = sand.u32 (!%p441_p9), 1, %s4440_s19  }
  0x14   : > { %3804 = vmatprep.subr.bf16.mxu0 (!%p441_p9), %v3803_v3  ;;  %v3218_v13 = vld [vmem:[%s6088_s1 + $0x118] sm:$0xff] (!%p441_p9)  ;;  %v3809_v14 = vpack.c.bf16 (!%p441_p9), %v3213_v11, %v3211_v10  ;;  %v3215_v16 = vld [vmem:[%s6088_s1 + $0x100] sm:$0xff] (!%p441_p9)  ;;  %v3217_v17 = vld [vmem:[%s6088_s1 + $0x110] sm:$0xff] (!%p441_p9)  ;;  %vm1630_vm6 = vcmask (!%p441_p9), 687104   ;;  %vm1626_vm7 = vcmask (!%p441_p9), 1046528   ;;  %vm1828_vm8 = vcmask (!%p441_p9), 1045504  }
  0x15   : > { %3806 = vmatpush1.bf16.msra.mxu0 (!%p441_p9), %v3805_v8  ;;  %v3811_v15 = vpack.c.bf16 (!%p441_p9), %v3218_v13, %v3216_v12  ;;  %v3220_v18 = vld [vmem:[%s6088_s1 + $0x128] sm:$0xff] (!%p441_p9)  ;;  %v3222_v19 = vld [vmem:[%s6088_s1 + $0x138] sm:$0xff] (!%p441_p9)  ;;  %v3813_v20 = vpack.c.bf16 (!%p441_p9), %v3217_v17, %v3215_v16  ;;  %v3219_v22 = vld [vmem:[%s6088_s1 + $0x120] sm:$0xff] (!%p441_p9)  ;;  %vm1946_vm9 = vcmask (!%p441_p9), 1044480   ;;  %vm2183_vm10 = vcmask (!%p441_p9), 1041408   ;;  %s3543_s23 = sshll.u32 (!%p441_p9), %s4556_s22, 4 }
  0x16   : > { %3808 = vmatprep.subr.bf16.mxu0 (!%p441_p9), %v3807_v9  ;;  %v3815_v21 = vpack.c.bf16 (!%p441_p9), %v3222_v19, %v3220_v18  ;;  %v3221_v23 = vld [vmem:[%s6088_s1 + $0x130] sm:$0xff] (!%p441_p9)  ;;  %v3224_v24 = vld [vmem:[%s6088_s1 + $0x148] sm:$0xff] (!%p441_p9)  ;;  %v3226_v25 = vld [vmem:[%s6088_s1 + $0x158] sm:$0xff] (!%p441_p9)  ;;  %vm2179_vm12 = vcmask (!%p441_p9), 80896   ;;  %vm2359_vm13 = vcmask (!%p441_p9), 261120   ;;  %vm4453_vm14 = vmmov (!%p441_p9), 0   ;;  %s6045_s27 = scalar_lea.hbm (!%p441_p9), %s6102_s15, %s3543_s23 }
  0x17   : > { %v3817_v26 = vpack.c.bf16 (!%p441_p9), %v3221_v23, %v3219_v22  ;;  %v3819_v27 = vpack.c.bf16 (!%p441_p9), %v3226_v25, %v3224_v24  ;;  %v3223_v28 = vld [vmem:[%s6088_s1 + $0x140] sm:$0xff] (!%p441_p9)  ;;  %v3225_v29 = vld [vmem:[%s6088_s1 + $0x150] sm:$0xff] (!%p441_p9)  ;;  %v3228_v30 = vld [vmem:[%s6088_s1 + $0x168] sm:$0xff] (!%p441_p9)  ;;  %vm2536_vm15 = vcmask (!%p441_p9), 654336   ;;  %s3134_s24 = scalar_lea.sflag (!%p441_p9), [#allocation3], %s485_s29 }
  0x18   : > { %v3230_v31 = vld [vmem:[%s6088_s1 + $0x178] sm:$0xff] (!%p441_p9)  ;;  %v3821_v32 = vpack.c.bf16 (!%p441_p9), %v3225_v29, %v3223_v28  ;;  %v3227_v34 = vld [vmem:[%s6088_s1 + $0x160] sm:$0xff] (!%p441_p9)  ;;  %v3229_v35 = vld [vmem:[%s6088_s1 + $0x170] sm:$0xff] (!%p441_p9) }
  0x19   : > { %3810 = vmatpush1.bf16.msra.mxu0 %v3809_v14  ;;  %s488_s30 = scalar_select %p487_p10, %s4556_s22, 1  ;;  %v3823_v33 = vpack.c.bf16 %v3230_v31, %v3228_v30  ;;  %v497_v36 = vld [vmem:[%s6088_s1 + $0x8] sm:$0xff]  ;;  %v499_v37 = vld [vmem:[%s6088_s1 + $0x18] sm:$0xff]  ;;  %v3825_v38 = vpack.c.bf16 %v3229_v35, %v3227_v34  ;;  %v496_v40 = vld [vmem:[%s6088_s1] sm:$0xff] }
  0x1a   : > { %3812 = vmatprep.subr.bf16.mxu0 %v3811_v15  ;;  %v3827_v39 = vpack.c.bf16 %v499_v37, %v497_v36  ;;  %v498_v41 = vld [vmem:[%s6088_s1 + $0x10] sm:$0xff]  ;;  %v501_v42 = vld [vmem:[%s6088_s1 + $0x28] sm:$0xff]  ;;  %v503_v43 = vld [vmem:[%s6088_s1 + $0x38] sm:$0xff]  ;;  %s4454_s22 = smov [#allocation2]  }
  0x1b   : > { %s3546_s25 = sshll.u32 %s488_s30, 5  ;;  %v3829_v45 = vpack.c.bf16 %v498_v41, %v496_v40  ;;  %v3831_v46 = vpack.c.bf16 %v503_v43, %v501_v42  ;;  %v500_v47 = vld [vmem:[%s6088_s1 + $0x20] sm:$0xff]  ;;  %v502_v48 = vld [vmem:[%s6088_s1 + $0x30] sm:$0xff]  ;;  %v505_v49 = vld [vmem:[%s6088_s1 + $0x48] sm:$0xff]  ;;  %s4390_s21 = sshll.u32 %s4454_s22, 4  ;;  %s4391_s21 = int_to_ptr.vmem [resolvable:$false] %s4390_s21 }
  0x1c   : > { %s4668_s17 = scalar_lea.vmem %s6087_s0, %s3546_s25  ;;  %v507_v50 = vld [vmem:[%s6088_s1 + $0x58] sm:$0xff]  ;;  %v3833_v51 = vpack.c.bf16 %v502_v48, %v500_v47  ;;  %v504_v54 = vld [vmem:[%s6088_s1 + $0x40] sm:$0xff]  ;;  %v506_v55 = vld [vmem:[%s6088_s1 + $0x50] sm:$0xff]  ;;  %s486_s25 = scalar_lea.vmem [#allocation2], %s485_s29 }
  0x1d   : > { %3814 = vmatpush1.bf16.msra.mxu0 %v3813_v20  ;;  %v520_v44 = vld [vmem:[%s4668_s17 + $0x1] sm:$0xff]  ;;  %v521_v52 = vld [vmem:[%s4668_s17 + $0x9] sm:$0xff]  ;;  %v3835_v53 = vpack.c.bf16 %v507_v50, %v505_v49  ;;  %v511_v57 = vld [vmem:[%s6088_s1 + $0x78] sm:$0xff]  ;;  %v3837_v58 = vpack.c.bf16 %v506_v55, %v504_v54  ;;  %s3146_s26 = sshll.u32 %s486_s25, 4  ;;  %s4392_s18 = scalar_lea.vmem %s4391_s21, 32  ;;  %s6047_s26 = int_to_ptr.vmem [resolvable:$true] %s3146_s26 }
  0x1e   : > { %3816 = vmatprep.subr.bf16.mxu0 %v3815_v21  ;;  %v509_v56 = vld [vmem:[%s6088_s1 + $0x68] sm:$0xff]  ;;  %v522_v59 = vld [vmem:[%s4668_s17 + $0x11] sm:$0xff]  ;;  %v508_v61 = vld [vmem:[%s6088_s1 + $0x60] sm:$0xff]  ;;  %p4393_p0 = scmp.lt.s32.totalorder %s6047_s26, %s4391_s21 }
  0x1f   : > { %v3839_v60 = vpack.c.bf16 %v511_v57, %v509_v56  ;;  %v510_v62 = vld [vmem:[%s6088_s1 + $0x70] sm:$0xff]  ;;  %v513_v63 = vld [vmem:[%s6088_s1 + $0x88] sm:$0xff]  ;;  %v515_v0 = vld [vmem:[%s6088_s1 + $0x98] sm:$0xff] }
  0x20   : > { %v3841_v1 = vpack.c.bf16 %v510_v62, %v508_v61  ;;  %v523_v2 = vld [vmem:[%s4668_s17 + $0x19] sm:$0xf]  ;;  %v3843_v3 = vpack.c.bf16 %v515_v0, %v513_v63  ;;  %v512_v4 = vld [vmem:[%s6088_s1 + $0x80] sm:$0xff]  ;;  %v514_v5 = vld [vmem:[%s6088_s1 + $0x90] sm:$0xff] }
  0x21   : > { %3818 = vmatpush1.bf16.msra.mxu0 %v3817_v26  ;;  %v517_v6 = vld [vmem:[%s6088_s1 + $0xa8] sm:$0xff]  ;;  %v519_v8 = vld [vmem:[%s6088_s1 + $0xb8] sm:$0xff]  ;;  %v3845_v9 = vpack.c.bf16 %v514_v5, %v512_v4  ;;  %v516_v11 = vld [vmem:[%s6088_s1 + $0xa0] sm:$0xff] }
  0x22   : > { %3820 = vmatprep.subr.bf16.mxu0 %v3819_v27  ;;  %v3847_v10 = vpack.c.bf16 %v519_v8, %v517_v6  ;;  %v518_v12 = vld [vmem:[%s6088_s1 + $0xb0] sm:$0xff]  ;;  %v3240_v13 = vld [vmem:[%s6088_s1 + $0x188] sm:$0xff]  ;;  %v3242_v14 = vld [vmem:[%s6088_s1 + $0x198] sm:$0xff] }
  0x23   : > { %v3849_v15 = vpack.c.bf16 %v518_v12, %v516_v11  ;;  %v3851_v16 = vpack.c.bf16 %v3242_v14, %v3240_v13  ;;  %v3239_v17 = vld [vmem:[%s6088_s1 + $0x180] sm:$0xff]  ;;  %v3241_v18 = vld [vmem:[%s6088_s1 + $0x190] sm:$0xff]  ;;  %v3244_v19 = vld [vmem:[%s6088_s1 + $0x1a8] sm:$0xff] }
  0x24   : > { %v3246_v20 = vld [vmem:[%s6088_s1 + $0x1b8] sm:$0xff]  ;;  %v492_v21 = vld [vmem:[%s4668_s17] sm:$0xff]  ;;  %v3853_v22 = vpack.c.bf16 %v3241_v18, %v3239_v17  ;;  %v3245_v25 = vld [vmem:[%s6088_s1 + $0x1b0] sm:$0xff] }
  0x25   : > { %3822 = vmatpush1.bf16.msra.mxu0 %v3821_v32  ;;  %v3855_v23 = vpack.c.bf16 %v3246_v20, %v3244_v19  ;;  %v3243_v24 = vld [vmem:[%s6088_s1 + $0x1a0] sm:$0xff]  ;;  %v3248_v26 = vld [vmem:[%s6088_s1 + $0x1c8] sm:$0xff]  ;;  %v3250_v27 = vld [vmem:[%s6088_s1 + $0x1d8] sm:$0xff] }
  0x26   : > { %3824 = vmatprep.subr.bf16.mxu0 %v3823_v33  ;;  %v3857_v28 = vpack.c.bf16 %v3245_v25, %v3243_v24  ;;  %v493_v29 = vld [vmem:[%s4668_s17 + $0x8] sm:$0xff]  ;;  %v3859_v30 = vpack.c.bf16 %v3250_v27, %v3248_v26  ;;  %v3247_v31 = vld [vmem:[%s6088_s1 + $0x1c0] sm:$0xff]  ;;  %v3249_v32 = vld [vmem:[%s6088_s1 + $0x1d0] sm:$0xff] }
  0x27   : > { %v3252_v33 = vld [vmem:[%s6088_s1 + $0x1e8] sm:$0xff]  ;;  %v3254_v34 = vld [vmem:[%s6088_s1 + $0x1f8] sm:$0xff]  ;;  %v3861_v35 = vpack.c.bf16 %v3249_v32, %v3247_v31  ;;  %v494_v36 = vld [vmem:[%s4668_s17 + $0x10] sm:$0xff] }
  0x28   : > { %v3863_v37 = vpack.c.bf16 %v3254_v34, %v3252_v33  ;;  %v3256_v40 = vld [vmem:[%s6088_s1 + $0x208] sm:$0xff]  ;;  %v3258_v41 = vld [vmem:[%s6088_s1 + $0x218] sm:$0xff]  ;;  %v3267_v57 = vld [vmem:[%s6088_s1 + $0x240] sm:$0xff] }
  0x29   : > { %3826 = vmatpush1.bf16.msra.mxu0 %v3825_v38  ;;  %v3251_v38 = vld [vmem:[%s6088_s1 + $0x1e0] sm:$0xff]  ;;  %v495_v43 = vld [vmem:[%s4668_s17 + $0x18] sm:$0xf]  ;;  %v3260_v47 = vld [vmem:[%s6088_s1 + $0x228] sm:$0xff] }
  0x2a   : > { %3828 = vmatprep.subr.bf16.mxu0 %v3827_v39  ;;  %v3253_v39 = vld [vmem:[%s6088_s1 + $0x1f0] sm:$0xff]  ;;  %v3262_v48 = vld [vmem:[%s6088_s1 + $0x238] sm:$0xff]  ;;  %v752_v61 = vld [vmem:[%s4668_s17 + $0x2] sm:$0xff] }
  0x2b   : > { %v3865_v42 = vpack.c.bf16 %v3253_v39, %v3251_v38  ;;  %v3871_v50 = vpack.c.bf16 %v3262_v48, %v3260_v47  ;;  %v3270_v54 = vld [vmem:[%s6088_s1 + $0x258] sm:$0xff]  ;;  %v3271_v0 = vld [vmem:[%s6088_s1 + $0x260] sm:$0xff]  ;;  %v753_v5 = vld [vmem:[%s4668_s17 + $0xa] sm:$0xff] }
  0x2c   : > { %3231 = vmatmul.mubr.msk.f32.vlgmr.msra.gmra.mrb[0].mxu0 %vm549_vm0, %v520_v44  ;;  %v3867_v44 = vpack.c.bf16 %v3258_v41, %v3256_v40  ;;  %v3275_v8 = vld [vmem:[%s6088_s1 + $0x280] sm:$0xff]  ;;  %v3282_v11 = vld [vmem:[%s6088_s1 + $0x2b8] sm:$0xff]  ;;  %v3284_v17 = vld [vmem:[%s6088_s1 + $0x2c8] sm:$0xff] }
  0x2d   : > { %3830 = vmatpush1.bf16.msra.mxu0 %v3829_v45  ;;  %632 = vmatprep.mubr.f32.mxu0 %v4450_v7  ;;  %v3255_v45 = vld [vmem:[%s6088_s1 + $0x200] sm:$0xff]  ;;  %v754_v13 = vld [vmem:[%s4668_s17 + $0x12] sm:$0xff]  ;;  %v755_v20 = vld [vmem:[%s4668_s17 + $0x1a] sm:$0xf] }
  0x2e   : > { %3832 = vmatprep.subr.bf16.mxu0 %v3831_v46  ;;  %v3257_v46 = vld [vmem:[%s6088_s1 + $0x210] sm:$0xff]  ;;  %v3286_v18 = vld [vmem:[%s6088_s1 + $0x2d8] sm:$0xff]  ;;  %v3288_v24 = vld [vmem:[%s6088_s1 + $0x2e8] sm:$0xff] }
  0x2f   : > { %v3869_v49 = vpack.c.bf16 %v3257_v46, %v3255_v45  ;;  %v3290_v25 = vld [vmem:[%s6088_s1 + $0x2f8] sm:$0xff]  ;;  %v3295_v34 = vld [vmem:[%s6088_s1 + $0x300] sm:$0xff]  ;;  %v891_v46 = vld [vmem:[%s4668_s17 + $0xb] sm:$0xff] }
  0x30   : > { %3232 = vmatmul.mubr.msk.f32.gmra.mrb[2].mxu0 %vm549_vm0, %v521_v52  ;;  %v3261_v52 = vld [vmem:[%s6088_s1 + $0x230] sm:$0xff]  ;;  %v3895_v27 = vpack.c.bf16 %v3290_v25, %v3288_v24  ;;  %v3298_v31 = vld [vmem:[%s6088_s1 + $0x318] sm:$0xff]  ;;  %v890_v38 = vld [vmem:[%s4668_s17 + $0x3] sm:$0xff] }
  0x31   : > { %3834 = vmatpush1.bf16.msra.mxu0 %v3833_v51  ;;  %638 = vmatprep.mubr.f32.mxu0 %v4450_v7  ;;  %v3259_v51 = vld [vmem:[%s6088_s1 + $0x220] sm:$0xff]  ;;  %vm3928_vm3 = vmpackc.low %vm1203_vm1, %vm4451_vm2 }
  0x32   : > { %3836 = vmatprep.subr.bf16.mxu0 %v3835_v53  ;;  %v3268_v53 = vld [vmem:[%s6088_s1 + $0x248] sm:$0xff]  ;;  %v3873_v55 = vpack.c.bf16 %v3261_v52, %v3259_v51  ;;  %v3299_v41 = vld [vmem:[%s6088_s1 + $0x320] sm:$0xff]  ;;  %v3310_v51 = vld [vmem:[%s6088_s1 + $0x378] sm:$0xff] }
  0x33   : > { %v3875_v56 = vpack.c.bf16 %v3270_v54, %v3268_v53  ;;  %v3303_v48 = vld [vmem:[%s6088_s1 + $0x340] sm:$0xff]  ;;  %v892_v53 = vld [vmem:[%s4668_s17 + $0x13] sm:$0xff]  ;;  %vm4104_vm11 = vmpackc.low %vm2183_vm10, %vm4451_vm2 }
  0x34   : > { %3233 = vmatmul.mubr.msk.f32.gmra.mrb[4].mxu0 %vm549_vm0, %v522_v59  ;;  %v3272_v59 = vld [vmem:[%s6088_s1 + $0x268] sm:$0xff] }
  0x35   : > { %3838 = vmatpush1.bf16.msra.mxu0 %v3837_v58  ;;  %644 = vmatprep.mubr.f32.mxu0 %v4450_v7  ;;  %v3269_v58 = vld [vmem:[%s6088_s1 + $0x250] sm:$0xff] }
  0x36   : > { %3840 = vmatprep.subr.bf16.mxu0 %v3839_v60  ;;  %v3274_v60 = vld [vmem:[%s6088_s1 + $0x278] sm:$0xff]  ;;  %v3877_v62 = vpack.c.bf16 %v3269_v58, %v3267_v57  ;;  %v3312_v57 = vld [vmem:[%s6088_s1 + $0x388] sm:$0xff] }
  0x37   : > { %v3879_v63 = vpack.c.bf16 %v3274_v60, %v3272_v59  ;;  %v3314_v58 = vld [vmem:[%s6088_s1 + $0x398] sm:$0xff] }
  0x38   : > { %3234 = vmatmul.mubr.msk.f32.gmra.mrb[6].mxu0 %vm549_vm0, %v523_v2  ;;  %v3276_v2 = vld [vmem:[%s6088_s1 + $0x288] sm:$0xff]  ;;  %v893_v60 = vld [vmem:[%s4668_s17 + $0x1b] sm:$0xf] }
  0x39   : > { %3842 = vmatpush1.bf16.msra.mxu0 %v3841_v1  ;;  %727 = vmatprep.mubr.f32.mxu0 %v4450_v7  ;;  %v3273_v1 = vld [vmem:[%s6088_s1 + $0x270] sm:$0xff] }
  0x3a   : > { %3844 = vmatprep.subr.bf16.mxu0 %v3843_v3  ;;  %v3278_v3 = vld [vmem:[%s6088_s1 + $0x298] sm:$0xff]  ;;  %v3881_v4 = vpack.c.bf16 %v3273_v1, %v3271_v0  ;;  %v3316_v0 = vld [vmem:[%s6088_s1 + $0x3a8] sm:$0xff] }
  0x3b   : > { %v3883_v6 = vpack.c.bf16 %v3278_v3, %v3276_v2  ;;  %v3318_v1 = vld [vmem:[%s6088_s1 + $0x3b8] sm:$0xff] }
  0x3c   : > { %v3919_v3 = vpack.c.bf16 %v3318_v1, %v3316_v0  ;;  %v1385_v0 = vld [vmem:[%s6091_s4 + $0x40] sm:$0xff]  ;;  %v1386_v1 = vld [vmem:[%s6091_s4 + $0x48] sm:$0xff] }
  0x3d   : > { %3846 = vmatpush1.bf16.msra.mxu0 %v3845_v9  ;;  %v3277_v9 = vld [vmem:[%s6088_s1 + $0x290] sm:$0xff] }
  0x3e   : > { %3848 = vmatprep.subr.bf16.mxu0 %v3847_v10  ;;  %v3280_v10 = vld [vmem:[%s6088_s1 + $0x2a8] sm:$0xff]  ;;  %v3885_v12 = vpack.c.bf16 %v3277_v9, %v3275_v8 }
  0x3f   : > { %v3887_v14 = vpack.c.bf16 %v3282_v11, %v3280_v10  ;;  %v1028_v8 = vld [vmem:[%s4668_s17 + $0x4] sm:$0xff]  ;;  %v1029_v9 = vld [vmem:[%s4668_s17 + $0xc] sm:$0xff]  ;;  %v1030_v10 = vld [vmem:[%s4668_s17 + $0x14] sm:$0xff] }
  0x40   : > { %v1031_v11 = vld [vmem:[%s4668_s17 + $0x1c] sm:$0xf]  ;;  %s4386_s17 = scalar_lea.vmem %s6047_s26, 16 }
  0x41   : > { %3850 = vmatpush1.bf16.msra.mxu0 %v3849_v15  ;;  %v3279_v15 = vld [vmem:[%s6088_s1 + $0x2a0] sm:$0xff]  ;;  %p4387_p11 = scmp.ne.s32.totalorder %s6047_s26, %s4386_s17  ;;  %p4394_p1 = scmp.lt.s32.totalorder %s4392_s18, %s4386_s17 }
  0x42   : > { %3852 = vmatprep.subr.bf16.mxu0 %v3851_v16  ;;  %v3281_v16 = vld [vmem:[%s6088_s1 + $0x2b0] sm:$0xff] }
  0x43   : > { %v3889_v19 = vpack.c.bf16 %v3281_v16, %v3279_v15  ;;  %v1166_v15 = vld [vmem:[%s6089_s2] sm:$0x3]  ;;  %p4388_p12 = pnand %p4387_p11, %p4573_p5  ;;  %p4395_p2 = por %p4394_p1, %p4393_p0 }
  0x44   : > { %3235 = vmatmul.mubr.msk.f32.vlgmr.msra.gmra.mrb[0].mxu0 %vm549_vm0, %v492_v21  ;;  %v3891_v21 = vpack.c.bf16 %v3286_v18, %v3284_v17 }
  0x45   : > { %3854 = vmatpush1.bf16.msra.mxu0 %v3853_v22  ;;  %733 = vmatprep.mubr.f32.mxu0 %v4450_v7  ;;  %v3283_v22 = vld [vmem:[%s6088_s1 + $0x2c0] sm:$0xff]  ;;  %p4389_p13 = pneg %p4388_p12 }
  0x46   : > { %3856 = vmatprep.subr.bf16.mxu0 %v3855_v23  ;;  %v3285_v23 = vld [vmem:[%s6088_s1 + $0x2d0] sm:$0xff] }
  0x47   : > { %v3893_v26 = vpack.c.bf16 %v3285_v23, %v3283_v22  ;;  %p4396_p3 = pnand %p4395_p2, %p4389_p13 }
  0x48   : > { %3236 = vmatmul.mubr.msk.f32.gmra.mrb[2].mxu0 %vm549_vm0, %v493_v29  ;;  %v3289_v29 = vld [vmem:[%s6088_s1 + $0x2f0] sm:$0xff] }
  0x49   : > { %3858 = vmatpush1.bf16.msra.mxu0 %v3857_v28  ;;  %739 = vmatprep.mubr.f32.mxu0 %v4450_v7  ;;  %v3287_v28 = vld [vmem:[%s6088_s1 + $0x2e0] sm:$0xff] }
  0x4a   : > { %3860 = vmatprep.subr.bf16.mxu0 %v3859_v30  ;;  %v3296_v30 = vld [vmem:[%s6088_s1 + $0x308] sm:$0xff]  ;;  %v3897_v32 = vpack.c.bf16 %v3289_v29, %v3287_v28 }
  0x4b   : > { %v3899_v33 = vpack.c.bf16 %v3298_v31, %v3296_v30 }
  0x4c   : > { %3237 = vmatmul.mubr.msk.f32.gmra.mrb[4].mxu0 %vm549_vm0, %v494_v36  ;;  %v3300_v36 = vld [vmem:[%s6088_s1 + $0x328] sm:$0xff] }
  0x4d   : > { %3862 = vmatpush1.bf16.msra.mxu0 %v3861_v35  ;;  %745 = vmatprep.mubr.f32.mxu0 %v4450_v7  ;;  %v3297_v35 = vld [vmem:[%s6088_s1 + $0x310] sm:$0xff] }
  0x4e   : > { %3864 = vmatprep.subr.bf16.mxu0 %v3863_v37  ;;  %v3302_v37 = vld [vmem:[%s6088_s1 + $0x338] sm:$0xff]  ;;  %v3901_v39 = vpack.c.bf16 %v3297_v35, %v3295_v34 }
  0x4f   : > { %v3903_v40 = vpack.c.bf16 %v3302_v37, %v3300_v36 }
  0x50   : > { %3238 = vmatmul.mubr.msk.f32.gmra.mrb[6].mxu0 %vm549_vm0, %v495_v43  ;;  %v3304_v43 = vld [vmem:[%s6088_s1 + $0x348] sm:$0xff] }
  0x51   : > { %3866 = vmatpush1.bf16.msra.mxu0 %v3865_v42  ;;  %857 = vmatprep.mubr.f32.mxu0 %v4450_v7  ;;  %v3301_v42 = vld [vmem:[%s6088_s1 + $0x330] sm:$0xff] }
  0x52   : > { %3868 = vmatprep.subr.bf16.mxu0 %v3867_v44  ;;  %v3306_v44 = vld [vmem:[%s6088_s1 + $0x358] sm:$0xff]  ;;  %v3905_v45 = vpack.c.bf16 %v3301_v42, %v3299_v41 }
  0x53   : > { %v3907_v47 = vpack.c.bf16 %v3306_v44, %v3304_v43 }
  0x55   : > { %3870 = vmatpush1.bf16.msra.mxu0 %v3869_v49  ;;  %v3305_v49 = vld [vmem:[%s6088_s1 + $0x350] sm:$0xff] }
  0x56   : > { %3872 = vmatprep.subr.bf16.mxu0 %v3871_v50  ;;  %v3308_v50 = vld [vmem:[%s6088_s1 + $0x368] sm:$0xff]  ;;  %v3909_v52 = vpack.c.bf16 %v3305_v49, %v3303_v48  ;;  %v1377_v49 = vld [vmem:[%s6091_s4] sm:$0xff] }
  0x57   : > { %v3911_v54 = vpack.c.bf16 %v3310_v51, %v3308_v50  ;;  %v1195_v48 = vld [vmem:[%s6090_s3 + $0x8] sm:$0x3f]  ;;  %v3327_v51 = vld [vmem:[%s6090_s3 + $0x10] sm:$0xff] }
  0x58   : > { %v1378_v50 = vld [vmem:[%s6091_s4 + $0x8] sm:$0xff] }
  0x59   : > { %3874 = vmatpush1.bf16.msra.mxu0 %v3873_v55  ;;  %v3307_v55 = vld [vmem:[%s6088_s1 + $0x360] sm:$0xff] }
  0x5a   : > { %3876 = vmatprep.subr.bf16.mxu0 %v3875_v56  ;;  %v3309_v56 = vld [vmem:[%s6088_s1 + $0x370] sm:$0xff] }
  0x5b   : > { %v3913_v59 = vpack.c.bf16 %v3309_v56, %v3307_v55  ;;  %v1380_v55 = vld [vmem:[%s6091_s4 + $0x18] sm:$0xff] }
  0x5c   : > { %3263 = vmatmul.mubr.msk.f32.vlgmr.msra.gmra.mrb[0].mxu0 %vm549_vm0, %v752_v61  ;;  %v3915_v61 = vpack.c.bf16 %v3314_v58, %v3312_v57  ;;  %v3328_v56 = vld [vmem:[%s6090_s3 + $0x18] sm:$0x3f]  ;;  %v1381_v58 = vld [vmem:[%s6091_s4 + $0x20] sm:$0xff] }
  0x5d   : > { %3878 = vmatpush1.bf16.msra.mxu0 %v3877_v62  ;;  %863 = vmatprep.mubr.f32.mxu0 %v4450_v7  ;;  %v3311_v62 = vld [vmem:[%s6088_s1 + $0x380] sm:$0xff] }
  0x5e   : > { %3880 = vmatprep.subr.bf16.mxu0 %v3879_v63  ;;  %v3313_v63 = vld [vmem:[%s6088_s1 + $0x390] sm:$0xff] }
  0x5f   : > { %v3917_v2 = vpack.c.bf16 %v3313_v63, %v3311_v62  ;;  %v1384_v62 = vld [vmem:[%s6091_s4 + $0x38] sm:$0xff] }
  0x60   : > { %3264 = vmatmul.mubr.msk.f32.gmra.mrb[2].mxu0 %vm549_vm0, %v753_v5  ;;  %v3317_v5 = vld [vmem:[%s6088_s1 + $0x3b0] sm:$0xff] }
  0x61   : > { %3882 = vmatpush1.bf16.msra.mxu0 %v3881_v4  ;;  %869 = vmatprep.mubr.f32.mxu0 %v4450_v7  ;;  %v3315_v4 = vld [vmem:[%s6088_s1 + $0x3a0] sm:$0xff] }
  0x62   : > { %3884 = vmatprep.subr.bf16.mxu0 %v3883_v6  ;;  %v3921_v6 = vpack.c.bf16 %v3317_v5, %v3315_v4  ;;  %v1388_v4 = vld [vmem:[%s6091_s4 + $0x58] sm:$0xff] }
  0x64   : > { %3265 = vmatmul.mubr.msk.f32.gmra.mrb[4].mxu0 %vm549_vm0, %v754_v13 }
  0x65   : > { %3886 = vmatpush1.bf16.msra.mxu0 %v3885_v12  ;;  %875 = vmatprep.mubr.f32.mxu0 %v4450_v7  ;;  %v1168_v12 = vlaneseq }
  0x66   : > { %3888 = vmatprep.subr.bf16.mxu0 %v3887_v14 }
  0x67   : > { %v5012_v13 = vshrl.u32 %v1168_v12, 7 }
  0x68   : > { %3266 = vmatmul.mubr.msk.f32.gmra.mrb[6].mxu0 %vm549_vm0, %v755_v20 }
  0x69   : > { %3890 = vmatpush1.bf16.msra.mxu0 %v3889_v19  ;;  %995 = vmatprep.mubr.f32.mxu0 %v4450_v7  ;;  %v1170_v14 = vsub.s32 0, %v5012_v13  ;;  %v1174_v16 = vsub.s32 1, %v5012_v13  ;;  %v2178_v13 = vld [vmem:[%s6094_s7] sm:$0x1f] }
  0x6a   : > { %3892 = vmatprep.subr.bf16.mxu0 %v3891_v21 }
  0x6b   : > { %v1171_v17 = vrot.slane %v1166_v15, %v1170_v14  ;;  %v1175_v19 = vrot.slane %v1166_v15, %v1174_v16  ;;  %v1393_v15 = vld [vmem:[%s6091_s4 + $0x80] sm:$0xff] }
  0x6d   : > { %3894 = vmatpush1.bf16.msra.mxu0 %v3893_v26 }
  0x6e   : > { %3896 = vmatprep.subr.bf16.mxu0 %v3895_v27 }
  0x71   : > { %3898 = vmatpush1.bf16.msra.mxu0 %v3897_v32 }
  0x72   : > { %3900 = vmatprep.subr.bf16.mxu0 %v3899_v33 }
  0x74   : > { %3291 = vmatmul.mubr.msk.f32.vlgmr.msra.gmra.mrb[0].mxu0 %vm549_vm0, %v890_v38 }
  0x75   : > { %3902 = vmatpush1.bf16.msra.mxu0 %v3901_v39  ;;  %1001 = vmatprep.mubr.f32.mxu0 %v4450_v7 }
  0x76   : > { %3904 = vmatprep.subr.bf16.mxu0 %v3903_v40 }
  0x78   : > { %3292 = vmatmul.mubr.msk.f32.gmra.mrb[2].mxu0 %vm549_vm0, %v891_v46 }
  0x79   : > { %3906 = vmatpush1.bf16.msra.mxu0 %v3905_v45  ;;  %1007 = vmatprep.mubr.f32.mxu0 %v4450_v7 }
  0x7a   : > { %3908 = vmatprep.subr.bf16.mxu0 %v3907_v47  ;;  %v1194_v47 = vld [vmem:[%s6090_s3] sm:$0xff] }
  0x7c   : > { %3293 = vmatmul.mubr.msk.f32.gmra.mrb[4].mxu0 %vm549_vm0, %v892_v53  ;;  %v4452_v53 = vmov 0.0|0.0  }
  0x7d   : > { %3910 = vmatpush1.bf16.msra.mxu0 %v3909_v52  ;;  %1013 = vmatprep.mubr.f32.mxu0 %v4450_v7  ;;  %v3944_v52 = vpack.c.bf16 %v1378_v50, %v1377_v49  ;;  %v3345_v50 = vld [vmem:[%s6091_s4 + $0xf8] sm:$0xff] }
  0x7e   : > { %3912 = vmatprep.subr.bf16.mxu0 %v3911_v54  ;;  %v1379_v54 = vld [vmem:[%s6091_s4 + $0x10] sm:$0xff] }
  0x7f   : > { %v3947_v57 = vpack.c.bf16 %v1380_v55, %v1379_v54  ;;  %v3347_v54 = vld [vmem:[%s6091_s4 + $0x108] sm:$0xff]  ;;  %v3348_v55 = vld [vmem:[%s6091_s4 + $0x110] sm:$0xff] }
  0x80   : > { %3294 = vmatmul.mubr.msk.f32.gmra.mrb[6].mxu0 %vm549_vm0, %v893_v60 }
  0x81   : > { %3914 = vmatpush1.bf16.msra.mxu0 %v3913_v59  ;;  %1133 = vmatprep.mubr.f32.mxu0 %v4450_v7  ;;  %v1382_v59 = vld [vmem:[%s6091_s4 + $0x28] sm:$0xff] }
  0x82   : > { %3916 = vmatprep.subr.bf16.mxu0 %v3915_v61  ;;  %v3950_v60 = vpack.c.bf16 %v1382_v59, %v1381_v58  ;;  %v1383_v61 = vld [vmem:[%s6091_s4 + $0x30] sm:$0xff]  ;;  %v3350_v58 = vld [vmem:[%s6091_s4 + $0x120] sm:$0xff] }
  0x83   : > { %v3953_v63 = vpack.c.bf16 %v1384_v62, %v1383_v61  ;;  %v3352_v61 = vld [vmem:[%s6091_s4 + $0x130] sm:$0xff] }
  0x85   : > { %3918 = vmatpush1.bf16.msra.mxu0 %v3917_v2  ;;  %v3956_v2 = vpack.c.bf16 %v1386_v1, %v1385_v0  ;;  %v3354_v0 = vld [vmem:[%s6091_s4 + $0x140] sm:$0xff] }
  0x86   : > { %3920 = vmatprep.subr.bf16.mxu0 %v3919_v3  ;;  %v1387_v3 = vld [vmem:[%s6091_s4 + $0x50] sm:$0xff] }
  0x87   : > { %v3959_v5 = vpack.c.bf16 %v1388_v4, %v1387_v3  ;;  %v1580_v3 = vld [vmem:[%s6092_s5 + $0x8] sm:$0xff]  ;;  %v1582_v4 = vld [vmem:[%s6092_s5 + $0x18] sm:$0xff] }
  0x89   : > { %3922 = vmatpush1.bf16.msra.mxu0 %v3921_v6  ;;  %v1389_v6 = vld [vmem:[%s6091_s4 + $0x60] sm:$0xff] }
  0x8c   : > { %3319 = vmatmul.mubr.msk.f32.vlgmr.msra.gmra.mrb[0].mxu0 %vm549_vm0, %v1028_v8  ;;  %v1390_v8 = vld [vmem:[%s6091_s4 + $0x68] sm:$0xff] }
  0x8d   : > { %1139 = vmatprep.mubr.f32.mxu0 %v4450_v7 }
  0x90   : > { %3320 = vmatmul.mubr.msk.f32.gmra.mrb[2].mxu0 %vm549_vm0, %v1029_v9  ;;  %v3962_v9 = vpack.c.bf16 %v1390_v8, %v1389_v6  ;;  %v4023_v6 = vpack.c.bf16 %v1582_v4, %v1580_v3  ;;  %v1581_v8 = vld [vmem:[%s6092_s5 + $0x10] sm:$0xff]  ;;  %v3375_v3 = vld [vmem:[%s6092_s5 + $0x138] sm:$0xff]  ;;  %v3377_v4 = vld [vmem:[%s6092_s5 + $0x148] sm:$0xff] }
  0x91   : > { %1145 = vmatprep.mubr.f32.mxu0 %v4450_v7 }
  0x94   : > { %3321 = vmatmul.mubr.msk.f32.gmra.mrb[4].mxu0 %vm549_vm0, %v1030_v10  ;;  %v1391_v10 = vld [vmem:[%s6091_s4 + $0x70] sm:$0xff] }
  0x95   : > { %1151 = vmatprep.mubr.f32.mxu0 %v4450_v7 }
  0x98   : > { %3322 = vmatmul.mubr.msk.f32.gmra.mrb[6].mxu0 %vm549_vm0, %v1031_v11  ;;  %v1392_v11 = vld [vmem:[%s6091_s4 + $0x78] sm:$0xff]  ;;  %vm2968_vm0 = vcmask 982016  }
  0x99   : > { %1705 = vmatprep.mubr.f32.mxu0 %v4450_v7  ;;  %v3965_v12 = vpack.c.bf16 %v1392_v11, %v1391_v10  ;;  %v1586_v10 = vld [vmem:[%s6092_s5 + $0x38] sm:$0xff] }
 0x15f   : > { %v1135_v18 = vpop.f32.mrb[0].mxu0 }
 0x160   : > { %v1137_v20 = vpop.f32.mrb[1].mxu0  ;;  %v1178_v21 = vadd.f32 %v1171_v17, %v1135_v18 }
 0x161   : > { %v1179_v22 = vadd.f32 %v1175_v19, %v1137_v20  ;;  %v1396_v20 = vld [vmem:[%s6091_s4 + $0x98] sm:$0xff] }
 0x162   : > { %v1186_v27 = vmax.f32 %v1178_v21, 0.0 }
 0x163   : > { %v1141_v23 = vpop.f32.mrb[2].mxu0  ;;  %v1187_v29 = vmax.f32 %v1179_v22, 0.0  ;;  %v1397_v22 = vld [vmem:[%s6091_s4 + $0xa0] sm:$0xff] }
 0x164   : > { %v1180_v24 = vadd.f32 %v1171_v17, %v1141_v23  ;;  %v1143_v25 = vpop.f32.mrb[3].mxu0 }
 0x165   : > { %v1181_v26 = vadd.f32 %v1175_v19, %v1143_v25 }
 0x166   : > { %v1188_v28 = vmax.f32 %v1180_v24, 0.0 }
 0x167   : > { %v1189_v30 = vmax.f32 %v1181_v26, 0.0  ;;  %v1147_v31 = vpop.f32.mrb[4].mxu0 }
 0x168   : > { %v1149_v32 = vpop.f32.mrb[5].mxu0  ;;  %v3925_v33 = vpack.c.bf16 %v1188_v28, %v1186_v27  ;;  %v1182_v35 = vadd.f32 %v1171_v17, %v1147_v31  ;;  %v3335_v27 = vld [vmem:[%s6091_s4 + $0xa8] sm:$0xff]  ;;  %v3336_v28 = vld [vmem:[%s6091_s4 + $0xb0] sm:$0xff] }
 0x169   : > { %v3923_v34 = vpack.c.bf16 %v1189_v30, %v1187_v29  ;;  %v1183_v36 = vadd.f32 %v1175_v19, %v1149_v32 }
 0x16a   : > { %v1190_v41 = vmax.f32 %v1182_v35, 0.0  ;;  %v3338_v35 = vld [vmem:[%s6091_s4 + $0xc0] sm:$0xff] }
 0x16b   : > { %v1153_v37 = vpop.f32.mrb[6].mxu0  ;;  %3924 = vmatprep.subr.bf16.mxu1 %v3923_v34  ;;  %v1191_v43 = vmax.f32 %v1183_v36, 0.0 }
 0x16c   : > { %v1184_v38 = vadd.f32 %v1171_v17, %v1153_v37  ;;  %v1155_v39 = vpop.f32.mrb[7].mxu0  ;;  %3926 = vmatpush1.bf16.msra.mxu1 %v3925_v33  ;;  %v1394_v17 = vld [vmem:[%s6091_s4 + $0x88] sm:$0xff] }
 0x16d   : > { %v1185_v40 = vadd.f32 %v1175_v19, %v1155_v39  ;;  %v3968_v18 = vpack.c.bf16 %v1394_v17, %v1393_v15  ;;  %v1395_v19 = vld [vmem:[%s6091_s4 + $0x90] sm:$0xff]  ;;  %v1583_v15 = vld [vmem:[%s6092_s5 + $0x20] sm:$0xff] }
 0x16e   : > { %v1192_v42 = vmax.f32 %v1184_v38, 0.0  ;;  %v3971_v21 = vpack.c.bf16 %v1396_v20, %v1395_v19  ;;  %v1585_v17 = vld [vmem:[%s6092_s5 + $0x30] sm:$0xff]  ;;  %v3361_v19 = vld [vmem:[%s6092_s5 + $0xc8] sm:$0xff] }
 0x16f   : > { %v1193_v44 = vmax.f32 %v1185_v40, 0.0  ;;  %v1588_v20 = vld [vmem:[%s6092_s5 + $0x48] sm:$0xff] }
 0x170   : > { %v3930_v45 = vpack.c.bf16 %v1192_v42, %v1190_v41  ;;  %v3339_v41 = vld [vmem:[%s6091_s4 + $0xc8] sm:$0xff]  ;;  %v3340_v42 = vld [vmem:[%s6091_s4 + $0xd0] sm:$0xff] }
 0x171   : > { %v3927_v46 = vpack.c.bf16 %v1193_v44, %v1191_v43  ;;  %v3980_v43 = vpack.c.bf16 %v3340_v42, %v3339_v41  ;;  %v3341_v44 = vld [vmem:[%s6091_s4 + $0xd8] sm:$0xff]  ;;  %v3369_v41 = vld [vmem:[%s6092_s5 + $0x108] sm:$0xff] }
 0x173   : > { %3929 = vmatprep.subr.msk.bf16.mxu1 %vm3928_vm3, %v3927_v46 }
 0x174   : > { %3932 = vmatpush1.bf16.msk.msra.mxu1 %vm3928_vm3, %v3930_v45 }
 0x175   : > { %3934 = vmatprep.subr.bf16.mxu1 %v3923_v34  ;;  %v3337_v34 = vld [vmem:[%s6091_s4 + $0xb8] sm:$0xff] }
 0x176   : > { %v3977_v40 = vpack.c.bf16 %v3338_v35, %v3337_v34  ;;  %v1594_v34 = vld [vmem:[%s6092_s5 + $0x78] sm:$0xff]  ;;  %v3362_v35 = vld [vmem:[%s6092_s5 + $0xd0] sm:$0xff] }
 0x177   : > { %3325 = vmatmul.mubr.msk.f32.vlgmr.msra.gmra.mrb[0].mxu1 %vm1196_vm4, %v1194_v47  ;;  %v3343_v47 = vld [vmem:[%s6091_s4 + $0xe8] sm:$0xff] }
 0x178   : > { %3936 = vmatpush1.bf16.msra.mxu1 %v3925_v33  ;;  %1280 = vmatprep.mubr.f32.mxu1 %v4450_v7  ;;  %v3974_v33 = vpack.c.bf16 %v3336_v28, %v3335_v27 }
 0x179   : > { %3939 = vmatprep.subr.msk.bf16.mxu1 %vm3928_vm3, %v3927_v46 }
 0x17b   : > { %3326 = vmatmul.mubr.msk.f32.gmra.mrb[2].mxu1 %vm1196_vm4, %v1195_v48  ;;  %v3344_v48 = vld [vmem:[%s6091_s4 + $0xf0] sm:$0xff] }
 0x17c   : > { %3942 = vmatpush1.bf16.msk.msra.mxu1 %vm3928_vm3, %v3930_v45  ;;  %1360 = vmatprep.mubr.f32.mxu1 %v4450_v7  ;;  %v3342_v45 = vld [vmem:[%s6091_s4 + $0xe0] sm:$0xff]  ;;  %v3986_v49 = vpack.c.bf16 %v3344_v48, %v3343_v47  ;;  %v1596_v47 = vld [vmem:[%s6092_s5 + $0x88] sm:$0xff]  ;;  %v1598_v48 = vld [vmem:[%s6092_s5 + $0x98] sm:$0xff] }
 0x17d   : > { %3943 = vmatprep.subr.bf16.mxu1 %v4452_v53  ;;  %v3983_v46 = vpack.c.bf16 %v3342_v45, %v3341_v44  ;;  %v3366_v45 = vld [vmem:[%s6092_s5 + $0xf0] sm:$0xff] }
 0x17f   : > { %3331 = vmatmul.mubr.msk.f32.vlgmr.msra.gmra.mrb[4].mxu1 %vm1196_vm4, %v3327_v51  ;;  %v3346_v51 = vld [vmem:[%s6091_s4 + $0x100] sm:$0xff] }
 0x180   : > { %1366 = vmatprep.mubr.f32.mxu1 %v4450_v7  ;;  %3945 = vmatpush1.bf16.msra.mxu1 %v3944_v52  ;;  %v3989_v52 = vpack.c.bf16 %v3346_v51, %v3345_v50  ;;  %v4039_v51 = vpack.c.bf16 %v1598_v48, %v1596_v47 }
 0x181   : > { %3946 = vmatprep.subr.bf16.mxu1 %v4452_v53 }
 0x183   : > { %3332 = vmatmul.mubr.msk.f32.gmra.mrb[6].mxu1 %vm1196_vm4, %v3328_v56  ;;  %v3992_v56 = vpack.c.bf16 %v3348_v55, %v3347_v54  ;;  %v1597_v54 = vld [vmem:[%s6092_s5 + $0x90] sm:$0xff] }
 0x184   : > { %3948 = vmatpush1.bf16.msra.mxu1 %v3947_v57  ;;  %v3349_v57 = vld [vmem:[%s6091_s4 + $0x118] sm:$0xff] }
 0x185   : > { %3949 = vmatprep.subr.bf16.mxu1 %v4452_v53  ;;  %v3995_v59 = vpack.c.bf16 %v3350_v58, %v3349_v57  ;;  %v3373_v57 = vld [vmem:[%s6092_s5 + $0x128] sm:$0xff] }
 0x188   : > { %3951 = vmatpush1.bf16.msra.mxu1 %v3950_v60  ;;  %v3351_v60 = vld [vmem:[%s6091_s4 + $0x128] sm:$0xff] }
 0x189   : > { %3952 = vmatprep.subr.bf16.mxu1 %v4452_v53  ;;  %v3998_v62 = vpack.c.bf16 %v3352_v61, %v3351_v60  ;;  %v3372_v60 = vld [vmem:[%s6092_s5 + $0x120] sm:$0xff]  ;;  %v1600_v61 = vld [vmem:[%s6092_s5 + $0xa8] sm:$0xf] }
 0x18c   : > { %3954 = vmatpush1.bf16.msra.mxu1 %v3953_v63  ;;  %v3353_v63 = vld [vmem:[%s6091_s4 + $0x138] sm:$0xff] }
 0x18d   : > { %3955 = vmatprep.subr.bf16.mxu1 %v4452_v53  ;;  %v4001_v1 = vpack.c.bf16 %v3354_v0, %v3353_v63  ;;  %v3389_v63 = vld [vmem:[%s6092_s5 + $0x168] sm:$0xff]  ;;  %v3391_v0 = vld [vmem:[%s6092_s5 + $0x178] sm:$0xff] }
 0x190   : > { %3957 = vmatpush1.bf16.msra.mxu1 %v3956_v2  ;;  %v3355_v2 = vld [vmem:[%s6091_s4 + $0x148] sm:$0xff] }
 0x191   : > { %3958 = vmatprep.subr.bf16.mxu1 %v4452_v53 }
 0x194   : > { %3960 = vmatpush1.bf16.msra.mxu1 %v3959_v5  ;;  %v1579_v5 = vld [vmem:[%s6092_s5] sm:$0xff] }
 0x195   : > { %3961 = vmatprep.subr.bf16.mxu1 %v4452_v53  ;;  %v4025_v11 = vpack.c.bf16 %v1581_v8, %v1579_v5  ;;  %v4019_v5 = vpack.c.bf16 %v3377_v4, %v3375_v3  ;;  %v3376_v8 = vld [vmem:[%s6092_s5 + $0x140] sm:$0xff]  ;;  %v3417_v3 = vld [vmem:[%s6092_s5 + $0x228] sm:$0xff]  ;;  %v3414_v4 = vld [vmem:[%s6092_s5 + $0x210] sm:$0xff] }
 0x198   : > { %3963 = vmatpush1.bf16.msra.mxu1 %v3962_v9  ;;  %v1584_v9 = vld [vmem:[%s6092_s5 + $0x28] sm:$0xff] }
 0x199   : > { %3964 = vmatprep.subr.bf16.mxu1 %v4452_v53 }
 0x19c   : > { %3966 = vmatpush1.bf16.msra.mxu1 %v3965_v12  ;;  %v4027_v12 = vpack.c.bf16 %v1586_v10, %v1584_v9  ;;  %v3379_v10 = vld [vmem:[%s6092_s5 + $0x158] sm:$0xf] }
 0x19d   : > { %3967 = vmatprep.subr.bf16.mxu1 %v4452_v53 }
 0x1a0   : > { %3969 = vmatpush1.bf16.msra.mxu1 %v3968_v18  ;;  %v3359_v18 = vld [vmem:[%s6092_s5 + $0xb8] sm:$0xff] }
 0x1a1   : > { %3970 = vmatprep.subr.bf16.mxu1 %v4452_v53 }
 0x1a4   : > { %3972 = vmatpush1.bf16.msra.mxu1 %v3971_v21  ;;  %v1590_v21 = vld [vmem:[%s6092_s5 + $0x58] sm:$0xff] }
 0x1a5   : > { %1445 = vmatprep.subr.mxu1 %v4450_v7  ;;  %v4031_v27 = vpack.c.bf16 %v1590_v21, %v1588_v20  ;;  %v3390_v20 = vld [vmem:[%s6092_s5 + $0x170] sm:$0xff]  ;;  %v3393_v21 = vld [vmem:[%s6092_s5 + $0x188] sm:$0xff] }
 0x1a8   : > { %1446 = vmatpush1.msra.mxu1 %v1397_v22  ;;  %v4029_v22 = vpack.c.bf16 %v1585_v17, %v1583_v15 }
 0x1a9   : > { %3973 = vmatprep.subr.bf16.mxu1 %v4452_v53 }
 0x24a   : > { %v1276_v23 = vpop.f32.mrb[0].mxu1 }
 0x24b   : > { %v1278_v24 = vpop.f32.mrb[1].mxu1 }
 0x24e   : > { %v1282_v25 = vpop.f32.mrb[2].mxu1 }
 0x24f   : > { %v1284_v26 = vpop.f32.mrb[3].mxu1 }
 0x252   : > { %v1362_v29 = vpop.f32.mrb[4].mxu1 }
 0x253   : > { %v1373_v30 = vmax.f32 %v1276_v23, %v1362_v29  ;;  %v1364_v31 = vpop.f32.mrb[5].mxu1  ;;  %v4003_v23 = vpack.c.bf16 %v3361_v19, %v3359_v18  ;;  %v1589_v29 = vld [vmem:[%s6092_s5 + $0x50] sm:$0xff]  ;;  %v3388_v19 = vld [vmem:[%s6092_s5 + $0x160] sm:$0xff] }
 0x254   : > { %v1374_v32 = vmax.f32 %v1278_v24, %v1364_v31  ;;  %v3358_v24 = vld [vmem:[%s6092_s5 + $0xb0] sm:$0xff]  ;;  %v3365_v31 = vld [vmem:[%s6092_s5 + $0xe8] sm:$0xff] }
 0x255   : > { %4004 = vmatprep.subr.bf16.mxu0 %v4003_v23 }
 0x256   : > { %v1368_v36 = vpop.f32.mrb[6].mxu1  ;;  %3333 = vmatprep.mubr.msk.f32.mxu1 %vm1398_vm5, %v1374_v32 }
 0x257   : > { %v1375_v37 = vmax.f32 %v1282_v25, %v1368_v36  ;;  %v1370_v38 = vpop.f32.mrb[7].mxu1  ;;  %1470 = vmatmul.mubr.f32.vlgmr.msra.gmra.mrb[8].mxu1 %v1373_v30  ;;  %v3360_v25 = vld [vmem:[%s6092_s5 + $0xc0] sm:$0xff] }
 0x258   : > { %v1376_v39 = vmax.f32 %v1284_v26, %v1370_v38  ;;  %3975 = vmatpush1.bf16.msra.mxu1 %v3974_v33  ;;  %v1587_v26 = vld [vmem:[%s6092_s5 + $0x40] sm:$0xff]  ;;  %v4005_v28 = vpack.c.bf16 %v3360_v25, %v3358_v24  ;;  %v1592_v33 = vld [vmem:[%s6092_s5 + $0x68] sm:$0xff]  ;;  %v4045_v24 = vpack.c.bf16 %v3390_v20, %v3388_v19 }
 0x259   : > { %3976 = vmatprep.subr.bf16.mxu1 %v4452_v53  ;;  %v3364_v36 = vld [vmem:[%s6092_s5 + $0xe0] sm:$0xff]  ;;  %v4035_v42 = vpack.c.bf16 %v1594_v34, %v1592_v33  ;;  %v3425_v19 = vld [vmem:[%s6092_s5 + $0x268] sm:$0xff] }
 0x25a   : > { %3334 = vmatprep.mubr.msk.f32.mxu1 %vm1398_vm5, %v1376_v39  ;;  %4006 = vmatpush1.bf16.msra.mxu0 %v4005_v28  ;;  %v4009_v38 = vpack.c.bf16 %v3364_v36, %v3362_v35  ;;  %v3392_v28 = vld [vmem:[%s6092_s5 + $0x180] sm:$0xff] }
 0x25b   : > { %1475 = vmatmul.mubr.f32.gmra.mrb[10].mxu1 %v1375_v37  ;;  %v3396_v34 = vld [vmem:[%s6092_s5 + $0x1a0] sm:$0xff] }
 0x25c   : > { %3978 = vmatpush1.bf16.msra.mxu1 %v3977_v40  ;;  %3356 = vmatprep.mubr.msk.f32.mxu1 %vm1398_vm5, %v1374_v32  ;;  %v3367_v40 = vld [vmem:[%s6092_s5 + $0xf8] sm:$0xff] }
 0x25d   : > { %3979 = vmatprep.subr.bf16.mxu1 %v4452_v53  ;;  %v4011_v44 = vpack.c.bf16 %v3369_v41, %v3367_v40  ;;  %v3403_v40 = vld [vmem:[%s6092_s5 + $0x1d8] sm:$0xff] }
 0x260   : > { %3981 = vmatpush1.bf16.msra.mxu1 %v3980_v43  ;;  %v1593_v43 = vld [vmem:[%s6092_s5 + $0x70] sm:$0xff] }
 0x261   : > { %3982 = vmatprep.subr.bf16.mxu1 %v4452_v53 }
 0x264   : > { %3984 = vmatpush1.bf16.msra.mxu1 %v3983_v46  ;;  %v3368_v46 = vld [vmem:[%s6092_s5 + $0x100] sm:$0xff] }
 0x265   : > { %3985 = vmatprep.subr.bf16.mxu1 %v4452_v53 }
 0x268   : > { %3987 = vmatpush1.bf16.msra.mxu1 %v3986_v49  ;;  %v4013_v49 = vpack.c.bf16 %v3368_v46, %v3366_v45 }
 0x269   : > { %3988 = vmatprep.subr.bf16.mxu1 %v4452_v53 }
 0x26c   : > { %3990 = vmatpush1.bf16.msra.mxu1 %v3989_v52  ;;  %v1595_v52 = vld [vmem:[%s6092_s5 + $0x80] sm:$0xff] }
 0x26d   : > { %3991 = vmatprep.subr.bf16.mxu1 %v4452_v53  ;;  %v4041_v55 = vpack.c.bf16 %v1597_v54, %v1595_v52  ;;  %v3400_v52 = vld [vmem:[%s6092_s5 + $0x1c0] sm:$0xff]  ;;  %v3402_v54 = vld [vmem:[%s6092_s5 + $0x1d0] sm:$0xff] }
 0x270   : > { %3993 = vmatpush1.bf16.msra.mxu1 %v3992_v56  ;;  %v3371_v56 = vld [vmem:[%s6092_s5 + $0x118] sm:$0xff] }
 0x271   : > { %3994 = vmatprep.subr.bf16.mxu1 %v4452_v53  ;;  %v4015_v58 = vpack.c.bf16 %v3373_v57, %v3371_v56 }
 0x274   : > { %3996 = vmatpush1.bf16.msra.mxu1 %v3995_v59  ;;  %v3370_v59 = vld [vmem:[%s6092_s5 + $0x110] sm:$0xff] }
 0x275   : > { %3997 = vmatprep.subr.bf16.mxu1 %v4452_v53 }
 0x278   : > { %3999 = vmatpush1.bf16.msra.mxu1 %v3998_v62  ;;  %v4017_v62 = vpack.c.bf16 %v3372_v60, %v3370_v59  ;;  %v3407_v59 = vld [vmem:[%s6092_s5 + $0x1f8] sm:$0xff]  ;;  %v4057_v60 = vpack.c.bf16 %v3402_v54, %v3400_v52  ;;  %v3446_v52 = vld [vmem:[%s6092_s5 + $0x2f0] sm:$0xff]  ;;  %v3449_v54 = vld [vmem:[%s6092_s5 + $0x308] sm:$0xff] }
 0x279   : > { %4000 = vmatprep.subr.bf16.mxu1 %v4452_v53 }
 0x27c   : > { %4002 = vmatpush1.bf16.msra.mxu1 %v4001_v1  ;;  %v1599_v1 = vld [vmem:[%s6092_s5 + $0xa0] sm:$0xf] }
 0x27d   : > { %1542 = vmatprep.subr.mxu1 %v4450_v7 }
 0x280   : > { %1543 = vmatpush1.msra.mxu1 %v3355_v2  ;;  %v4043_v2 = vpack.c.bf16 %v3391_v0, %v3389_v63  ;;  %v3406_v63 = vld [vmem:[%s6092_s5 + $0x1f0] sm:$0xff] }
 0x281   : > { %1567 = vmatmul.mubr.f32.vlgmr.msra.gmra.mrb[12].mxu1 %v1373_v30  ;;  %4024 = vmatprep.subr.bf16.mxu1 %v4023_v6  ;;  %v3363_v30 = vld [vmem:[%s6092_s5 + $0xd8] sm:$0xff]  ;;  %v3374_v6 = vld [vmem:[%s6092_s5 + $0x130] sm:$0xff] }
 0x282   : > { %3357 = vmatprep.mubr.msk.f32.mxu1 %vm1398_vm5, %v1376_v39  ;;  %4026 = vmatpush1.bf16.msra.mxu1 %v4025_v11  ;;  %v4007_v32 = vpack.c.bf16 %v3365_v31, %v3363_v30  ;;  %v1591_v39 = vld [vmem:[%s6092_s5 + $0x60] sm:$0xff]  ;;  %v4021_v9 = vpack.c.bf16 %v3376_v8, %v3374_v6  ;;  %v3378_v11 = vld [vmem:[%s6092_s5 + $0x150] sm:$0xf]  ;;  %v3397_v30 = vld [vmem:[%s6092_s5 + $0x1a8] sm:$0xff] }
 0x283   : > { %4028 = vmatprep.subr.bf16.mxu1 %v4027_v12  ;;  %v4037_v50 = vpack.c.bf16 %v1593_v43, %v1591_v39  ;;  %v3399_v31 = vld [vmem:[%s6092_s5 + $0x1b8] sm:$0xff]  ;;  %v3401_v39 = vld [vmem:[%s6092_s5 + $0x1c8] sm:$0xff] }
 0x284   : > { %4008 = vmatprep.subr.bf16.mxu0 %v4007_v32  ;;  %v3419_v6 = vld [vmem:[%s6092_s5 + $0x238] sm:$0xff]  ;;  %v3421_v8 = vld [vmem:[%s6092_s5 + $0x248] sm:$0xff] }
 0x285   : > { %1572 = vmatmul.mubr.f32.gmra.mrb[14].mxu1 %v1375_v37  ;;  %v4033_v37 = vpack.c.bf16 %v1589_v29, %v1587_v26  ;;  %4010 = vmatpush1.bf16.msra.mxu0 %v4009_v38  ;;  %v3394_v29 = vld [vmem:[%s6092_s5 + $0x190] sm:$0xff] }
 0x286   : > { %1792 = vmatprep.mubr.f32.mxu1 %v4450_v7  ;;  %4030 = vmatpush1.bf16.msra.mxu1 %v4029_v22  ;;  %v3395_v22 = vld [vmem:[%s6092_s5 + $0x198] sm:$0xff]  ;;  %v4049_v33 = vpack.c.bf16 %v3394_v29, %v3392_v28  ;;  %v3398_v38 = vld [vmem:[%s6092_s5 + $0x1b0] sm:$0xff]  ;;  %v3428_v29 = vld [vmem:[%s6092_s5 + $0x280] sm:$0xff] }
 0x287   : > { %4032 = vmatprep.subr.bf16.mxu1 %v4031_v27  ;;  %4012 = vmatprep.subr.bf16.mxu0 %v4011_v44  ;;  %v4047_v27 = vpack.c.bf16 %v3395_v22, %v3393_v21  ;;  %v3422_v22 = vld [vmem:[%s6092_s5 + $0x250] sm:$0xff] }
 0x288   : > { %v3426_v28 = vld [vmem:[%s6092_s5 + $0x270] sm:$0xff] }
 0x289   : > { %4014 = vmatpush1.bf16.msra.mxu0 %v4013_v49  ;;  %v4053_v49 = vpack.c.bf16 %v3398_v38, %v3396_v34  ;;  %v3430_v34 = vld [vmem:[%s6092_s5 + $0x290] sm:$0xff]  ;;  %v3435_v38 = vld [vmem:[%s6092_s5 + $0x2b8] sm:$0xf] }
 0x28a   : > { %4034 = vmatpush1.bf16.msra.mxu1 %v4033_v37  ;;  %4016 = vmatprep.subr.bf16.mxu0 %v4015_v58  ;;  %v4051_v37 = vpack.c.bf16 %v3399_v31, %v3397_v30  ;;  %v3405_v58 = vld [vmem:[%s6092_s5 + $0x1e8] sm:$0xff]  ;;  %v3431_v30 = vld [vmem:[%s6092_s5 + $0x298] sm:$0xff] }
 0x28b   : > { %4036 = vmatprep.subr.bf16.mxu1 %v4035_v42  ;;  %v3433_v31 = vld [vmem:[%s6092_s5 + $0x2a8] sm:$0xff] }
 0x28d   : > { %4018 = vmatpush1.bf16.msra.mxu0 %v4017_v62  ;;  %v3404_v62 = vld [vmem:[%s6092_s5 + $0x1e0] sm:$0xff] }
 0x28e   : > { %4038 = vmatpush1.bf16.msra.mxu1 %v4037_v50  ;;  %4020 = vmatprep.subr.bf16.mxu0 %v4019_v5  ;;  %v4055_v50 = vpack.c.bf16 %v3403_v40, %v3401_v39  ;;  %v4061_v0 = vpack.c.bf16 %v3406_v63, %v3404_v62  ;;  %v3416_v5 = vld [vmem:[%s6092_s5 + $0x220] sm:$0xff]  ;;  %v3441_v39 = vld [vmem:[%s6092_s5 + $0x2c8] sm:$0xff]  ;;  %v3443_v40 = vld [vmem:[%s6092_s5 + $0x2d8] sm:$0xff] }
 0x28f   : > { %4040 = vmatprep.subr.bf16.mxu1 %v4039_v51  ;;  %v3453_v62 = vld [vmem:[%s6092_s5 + $0x328] sm:$0xff] }
 0x291   : > { %4022 = vmatpush1.bf16.msra.mxu0 %v4021_v9  ;;  %v3408_v9 = vld [vmem:[%s6092_s5 + $0x200] sm:$0xf] }
 0x292   : > { %4042 = vmatpush1.bf16.msra.mxu1 %v4041_v55  ;;  %3380 = vmatprep.subr.msk.mxu0 %vm1203_vm1, %v3379_v10 }
 0x293   : > { %3384 = vmatprep.subr.msk.mxu1 %vm1203_vm1, %v1600_v61  ;;  %v4059_v61 = vpack.c.bf16 %v3407_v59, %v3405_v58 }
 0x295   : > { %3381 = vmatpush1.msk.msra.mxu0 %vm1203_vm1, %v3378_v11  ;;  %v4065_v11 = vpack.c.bf16 %v3416_v5, %v3414_v4 }
 0x296   : > { %3385 = vmatpush1.msk.msra.mxu1 %vm1203_vm1, %v1599_v1  ;;  %v3409_v1 = vld [vmem:[%s6092_s5 + $0x208] sm:$0xf] }
 0x297   : > { %4044 = vmatprep.subr.bf16.mxu1 %v4043_v2  ;;  %v3415_v2 = vld [vmem:[%s6092_s5 + $0x218] sm:$0xff] }
 0x298   : > { %v4063_v10 = vpack.c.bf16 %v3417_v3, %v3415_v2  ;;  %v3454_v2 = vld [vmem:[%s6092_s5 + $0x330] sm:$0xff]  ;;  %v3457_v3 = vld [vmem:[%s6092_s5 + $0x348] sm:$0xff] }
 0x32a   : > { %v1471_v12 = vpop.f32.mrb[8].mxu1 }
 0x32b   : > { %v1473_v15 = vpop.f32.mrb[9].mxu1 }
 0x32c   : > { %v3418_v15 = vld [vmem:[%s6092_s5 + $0x230] sm:$0xff] }
 0x32e   : > { %v1476_v17 = vpop.f32.mrb[10].mxu1 }
 0x32f   : > { %v1478_v18 = vpop.f32.mrb[11].mxu1 }
 0x330   : > { %v3423_v18 = vld [vmem:[%s6092_s5 + $0x258] sm:$0xff] }
 0x331   : > { %v4071_v21 = vpack.c.bf16 %v3425_v19, %v3423_v18  ;;  %v2158_v19 = vld [vmem:[%s6093_s6] sm:$0x3] }
 0x354   : > { %v1568_v23 = vpop.f32.mrb[12].mxu1 }
 0x355   : > { %v1577_v25 = vmax.f32 %v1471_v12, %v1568_v23  ;;  %v1570_v26 = vpop.f32.mrb[13].mxu1  ;;  %v4067_v12 = vpack.c.bf16 %v3421_v8, %v3419_v6  ;;  %v3424_v23 = vld [vmem:[%s6092_s5 + $0x260] sm:$0xff]  ;;  %v3458_v8 = vld [vmem:[%s6092_s5 + $0x350] sm:$0xff] }
 0x356   : > { %v4073_v26 = vpack.c.bf16 %v3424_v23, %v3422_v22  ;;  %v3456_v6 = vld [vmem:[%s6092_s5 + $0x340] sm:$0xff] }
 0x357   : > { %3386 = vmatmul.mubr.msk.f32.vlgmr.msra.gmra.mrb[16].mxu1 %vm1630_vm6, %v1577_v25  ;;  %v1627_v41 = vrot.slane %v1577_v25, 1  ;;  %v1829_v42 = vrot.slane %v1577_v25, 2  ;;  %v1947_v43 = vrot.slane %v1577_v25, 3  ;;  %v2064_v44 = vrot.slane %v1577_v25, 4  ;;  %v3429_v25 = vld [vmem:[%s6092_s5 + $0x288] sm:$0xff] }
 0x358   : > { %4046 = vmatpush1.bf16.msra.mxu1 %v4045_v24  ;;  %v1573_v32 = vpop.f32.mrb[14].mxu1  ;;  %1798 = vmatprep.mubr.f32.mxu1 %v4450_v7  ;;  %v3427_v24 = vld [vmem:[%s6092_s5 + $0x278] sm:$0xff] }
 0x359   : > { %v5368_v35 = vmax.f32 %v1476_v17, %v1573_v32  ;;  %v1575_v36 = vpop.f32.mrb[15].mxu1  ;;  %4048 = vmatprep.subr.bf16.mxu1 %v4047_v27  ;;  %v3420_v17 = vld [vmem:[%s6092_s5 + $0x240] sm:$0xff]  ;;  %v4075_v27 = vpack.c.bf16 %v3429_v25, %v3427_v24  ;;  %v4077_v32 = vpack.c.bf16 %v3428_v29, %v3426_v28 }
 0x35a   : > { %v4069_v20 = vpack.c.bf16 %v3420_v17, %v3418_v15  ;;  %v3432_v36 = vld [vmem:[%s6092_s5 + $0x2a0] sm:$0xff] }
 0x35b   : > { %3387 = vmatmul.mubr.msk.f32.gmra.mrb[18].mxu1 %vm1630_vm6, %v5368_v35  ;;  %v1628_v45 = vrot.slane %v5368_v35, 1  ;;  %v1830_v46 = vrot.slane %v5368_v35, 2  ;;  %v1948_v47 = vrot.slane %v5368_v35, 3  ;;  %v2065_v48 = vrot.slane %v5368_v35, 4 }
 0x35c   : > { %4050 = vmatpush1.bf16.msra.mxu1 %v4049_v33  ;;  %1906 = vmatprep.mubr.f32.mxu1 %v4450_v7  ;;  %v4079_v33 = vpack.c.bf16 %v3433_v31, %v3431_v30  ;;  %v2167_v35 = vrot.slane %v2158_v19, %v1174_v16  ;;  %v2339_v16 = vld [vmem:[%s6095_s8] sm:$0xff] }
 0x35d   : > { %v1629_v51 = vsel %vm1626_vm7, %v1627_v41, %v1628_v45  ;;  %4052 = vmatprep.subr.bf16.mxu1 %v4051_v37  ;;  %v1831_v55 = vsel %vm1828_vm8, %v1829_v42, %v1830_v46  ;;  %v5397_v56 = vsel %vm1946_vm9, %v1947_v43, %v1948_v47  ;;  %v5402_v57 = vsel %vm1203_vm1, %v2064_v44, %v2065_v48  ;;  %v3440_v41 = vld [vmem:[%s6092_s5 + $0x2c0] sm:$0xff]  ;;  %v3442_v42 = vld [vmem:[%s6092_s5 + $0x2d0] sm:$0xff]  ;;  %v3445_v43 = vld [vmem:[%s6092_s5 + $0x2e8] sm:$0xff] }
 0x35e   : > { %3382 = vmatmul.mubr.msk.f32.vlgmr.msra.gmra.mrb[8].mxu0 %vm1630_vm6, %v1629_v51  ;;  %v4081_v37 = vpack.c.bf16 %v3432_v36, %v3430_v34  ;;  %v3447_v44 = vld [vmem:[%s6092_s5 + $0x2f8] sm:$0xff]  ;;  %v3444_v51 = vld [vmem:[%s6092_s5 + $0x2e0] sm:$0xff] }
 0x35f   : > { %1711 = vmatprep.mubr.f32.mxu0 %v4450_v7  ;;  %v4089_v58 = vpack.c.bf16 %v3446_v52, %v3444_v51  ;;  %v2347_v51 = vld [vmem:[%s6095_s8 + $0x40] sm:$0xff]  ;;  %v2348_v52 = vld [vmem:[%s6095_s8 + $0x48] sm:$0xff] }
 0x360   : > { %4054 = vmatpush1.bf16.msra.mxu1 %v4053_v49  ;;  %v4085_v49 = vpack.c.bf16 %v3442_v42, %v3440_v41  ;;  %v2342_v41 = vld [vmem:[%s6095_s8 + $0x18] sm:$0xff] }
 0x361   : > { %4056 = vmatprep.subr.bf16.mxu1 %v4055_v50  ;;  %v4087_v50 = vpack.c.bf16 %v3447_v44, %v3445_v43  ;;  %v2343_v43 = vld [vmem:[%s6095_s8 + $0x20] sm:$0xff]  ;;  %v2344_v44 = vld [vmem:[%s6095_s8 + $0x28] sm:$0xff] }
 0x362   : > { %3383 = vmatmul.mubr.msk.f32.gmra.mrb[10].mxu0 %vm1630_vm6, %v1628_v45  ;;  %v3434_v45 = vld [vmem:[%s6092_s5 + $0x2b0] sm:$0xf] }
 0x363   : > { %2254 = vmatprep.mubr.f32.mxu0 %v4450_v7 }
 0x364   : > { %4058 = vmatpush1.bf16.msra.mxu1 %v4057_v60  ;;  %v3448_v60 = vld [vmem:[%s6092_s5 + $0x300] sm:$0xff] }
 0x365   : > { %4060 = vmatprep.subr.bf16.mxu1 %v4059_v61  ;;  %v3450_v61 = vld [vmem:[%s6092_s5 + $0x310] sm:$0xff] }
 0x366   : > { %v4093_v63 = vpack.c.bf16 %v3450_v61, %v3448_v60  ;;  %v2351_v60 = vld [vmem:[%s6095_s8 + $0x60] sm:$0xff]  ;;  %v2352_v61 = vld [vmem:[%s6095_s8 + $0x68] sm:$0xff] }
 0x368   : > { %4062 = vmatpush1.bf16.msra.mxu1 %v4061_v0 }
 0x369   : > { %3410 = vmatprep.subr.msk.mxu1 %vm1203_vm1, %v3409_v1  ;;  %v3452_v1 = vld [vmem:[%s6092_s5 + $0x320] sm:$0xff] }
 0x36a   : > { %v4097_v4 = vpack.c.bf16 %v3454_v2, %v3452_v1  ;;  %v2355_v1 = vld [vmem:[%s6095_s8 + $0x80] sm:$0xff]  ;;  %v2356_v2 = vld [vmem:[%s6095_s8 + $0x88] sm:$0xff] }
 0x36c   : > { %3411 = vmatpush1.msk.msra.mxu1 %vm1203_vm1, %v3408_v9  ;;  %v4101_v9 = vpack.c.bf16 %v3458_v8, %v3456_v6 }
 0x36d   : > { %3412 = vmatmul.mubr.msk.f32.vlgmr.msra.gmra.mrb[16].mxu1 %vm1630_vm6, %v1831_v55  ;;  %4064 = vmatprep.subr.bf16.mxu1 %v4063_v10  ;;  %v3451_v55 = vld [vmem:[%s6092_s5 + $0x318] sm:$0xff]  ;;  %v3461_v10 = vld [vmem:[%s6092_s5 + $0x368] sm:$0xf] }
 0x36e   : > { %4066 = vmatpush1.bf16.msra.mxu1 %v4065_v11  ;;  %1912 = vmatprep.mubr.f32.mxu1 %v4450_v7  ;;  %v4091_v59 = vpack.c.bf16 %v3451_v55, %v3449_v54  ;;  %v3460_v11 = vld [vmem:[%s6092_s5 + $0x360] sm:$0xf]  ;;  %v4128_v54 = vpack.c.bf16 %v2348_v52, %v2347_v51  ;;  %v2349_v55 = vld [vmem:[%s6095_s8 + $0x50] sm:$0xff] }
 0x36f   : > { %4068 = vmatprep.subr.bf16.mxu1 %v4067_v12  ;;  %v2532_v52 = vld [vmem:[%s6096_s9 + $0x30] sm:$0xff] }
 0x371   : > { %3413 = vmatmul.mubr.msk.f32.gmra.mrb[18].mxu1 %vm1630_vm6, %v1830_v46  ;;  %v4083_v46 = vpack.c.bf16 %v3443_v40, %v3441_v39  ;;  %v2341_v40 = vld [vmem:[%s6095_s8 + $0x10] sm:$0xff] }
 0x372   : > { %4070 = vmatpush1.bf16.msra.mxu1 %v4069_v20  ;;  %2024 = vmatprep.mubr.f32.mxu1 %v4450_v7  ;;  %v4119_v42 = vpack.c.bf16 %v2342_v41, %v2341_v40  ;;  %v2526_v41 = vld [vmem:[%s6096_s9] sm:$0xff] }
 0x373   : > { %4072 = vmatprep.subr.bf16.mxu1 %v4071_v21 }
 0x376   : > { %4074 = vmatpush1.bf16.msra.mxu1 %v4073_v26 }
 0x377   : > { %4076 = vmatprep.subr.bf16.mxu1 %v4075_v27 }
 0x37a   : > { %4078 = vmatpush1.bf16.msra.mxu1 %v4077_v32 }
 0x37b   : > { %4080 = vmatprep.subr.bf16.mxu1 %v4079_v33 }
 0x37e   : > { %4082 = vmatpush1.bf16.msra.mxu1 %v4081_v37  ;;  %v2340_v37 = vld [vmem:[%s6095_s8 + $0x8] sm:$0xff] }
 0x37f   : > { %3436 = vmatprep.subr.msk.mxu1 %vm1203_vm1, %v3435_v38  ;;  %v3469_v38 = vld [vmem:[%s6094_s7 + $0x8] sm:$0x1f]  ;;  %v4116_v39 = vpack.c.bf16 %v2340_v37, %v2339_v16 }
 0x380   : > { %v3491_v16 = vld [vmem:[%s6095_s8 + $0x128] sm:$0xff] }
 0x382   : > { %3437 = vmatpush1.msk.msra.mxu1 %vm1203_vm1, %v3434_v45  ;;  %v4122_v45 = vpack.c.bf16 %v2344_v44, %v2343_v43  ;;  %v2528_v43 = vld [vmem:[%s6096_s9 + $0x10] sm:$0xff] }
 0x383   : > { %3438 = vmatmul.mubr.msk.f32.vlgmr.msra.gmra.mrb[16].mxu1 %vm1630_vm6, %v5397_v56  ;;  %4084 = vmatprep.subr.bf16.mxu1 %v4083_v46  ;;  %v3455_v56 = vld [vmem:[%s6092_s5 + $0x338] sm:$0xff]  ;;  %v2345_v46 = vld [vmem:[%s6095_s8 + $0x30] sm:$0xff] }
 0x384   : > { %4086 = vmatpush1.bf16.msra.mxu1 %v4085_v49  ;;  %2030 = vmatprep.mubr.f32.mxu1 %v4450_v7  ;;  %v4095_v0 = vpack.c.bf16 %v3455_v56, %v3453_v62  ;;  %v2346_v49 = vld [vmem:[%s6095_s8 + $0x38] sm:$0xff]  ;;  %v4134_v62 = vpack.c.bf16 %v2352_v61, %v2351_v60  ;;  %v2353_v56 = vld [vmem:[%s6095_s8 + $0x70] sm:$0xff]  ;;  %v2952_v61 = vld [vmem:[%s6098_s11] sm:$0xff] }
 0x385   : > { %4088 = vmatprep.subr.bf16.mxu1 %v4087_v50  ;;  %v4125_v50 = vpack.c.bf16 %v2346_v49, %v2345_v46  ;;  %v2530_v49 = vld [vmem:[%s6096_s9 + $0x20] sm:$0xff] }
 0x387   : > { %3439 = vmatmul.mubr.msk.f32.gmra.mrb[18].mxu1 %vm1630_vm6, %v1948_v47  ;;  %v3459_v47 = vld [vmem:[%s6092_s5 + $0x358] sm:$0xff] }
 0x388   : > { %4090 = vmatpush1.bf16.msra.mxu1 %v4089_v58  ;;  %2141 = vmatprep.mubr.f32.mxu1 %v4450_v7  ;;  %v4099_v5 = vpack.c.bf16 %v3459_v47, %v3457_v3  ;;  %v2350_v58 = vld [vmem:[%s6095_s8 + $0x58] sm:$0xff]  ;;  %v4140_v3 = vpack.c.bf16 %v2356_v2, %v2355_v1  ;;  %v2357_v47 = vld [vmem:[%s6095_s8 + $0x90] sm:$0xff]  ;;  %v2956_v2 = vld [vmem:[%s6098_s11 + $0x20] sm:$0xff] }
 0x389   : > { %4092 = vmatprep.subr.bf16.mxu1 %v4091_v59  ;;  %v4131_v59 = vpack.c.bf16 %v2350_v58, %v2349_v55  ;;  %v2534_v58 = vld [vmem:[%s6096_s9 + $0x40] sm:$0xff] }
 0x38c   : > { %4094 = vmatpush1.bf16.msra.mxu1 %v4093_v63  ;;  %v2354_v63 = vld [vmem:[%s6095_s8 + $0x78] sm:$0xff] }
 0x38d   : > { %4096 = vmatprep.subr.bf16.mxu1 %v4095_v0  ;;  %v4137_v0 = vpack.c.bf16 %v2354_v63, %v2353_v56  ;;  %v2954_v56 = vld [vmem:[%s6098_s11 + $0x10] sm:$0xff] }
 0x390   : > { %4098 = vmatpush1.bf16.msra.mxu1 %v4097_v4  ;;  %v2358_v4 = vld [vmem:[%s6095_s8 + $0x98] sm:$0xff] }
 0x391   : > { %4100 = vmatprep.subr.bf16.mxu1 %v4099_v5  ;;  %v4143_v5 = vpack.c.bf16 %v2358_v4, %v2357_v47 }
 0x394   : > { %4102 = vmatpush1.bf16.msra.mxu1 %v4101_v9  ;;  %v3474_v9 = vld [vmem:[%s6095_s8 + $0xa0] sm:$0xff] }
 0x395   : > { %3462 = vmatprep.subr.msk.mxu1 %vm1203_vm1, %v3461_v10  ;;  %v3475_v10 = vld [vmem:[%s6095_s8 + $0xa8] sm:$0xff] }
 0x398   : > { %3463 = vmatpush1.msk.msra.mxu1 %vm1203_vm1, %v3460_v11 }
 0x399   : > { %3464 = vmatmul.mubr.msk.f32.vlgmr.msra.gmra.mrb[16].mxu1 %vm1630_vm6, %v5402_v57  ;;  %4175 = vmatprep.subr.bf16.mxu1 %v4452_v53  ;;  %v2163_v57 = vrot.slane %v2158_v19, %v1170_v14  ;;  %v3476_v19 = vld [vmem:[%s6095_s8 + $0xb0] sm:$0xff] }
 0x39a   : > { %2147 = vmatprep.mubr.f32.mxu1 %v4450_v7 }
 0x39d   : > { %3465 = vmatmul.mubr.msk.f32.gmra.mrb[18].mxu1 %vm1630_vm6, %v2065_v48 }
 0x39e   : > { %3650 = vmatprep.mubr.msk.f32.mxu1 %vm4453_vm14, %v4450_v7 }
 0x431   : > { %v1707_v12 = vpop.f32.mrb[8].mxu0 }
 0x432   : > { %v1709_v15 = vpop.f32.mrb[9].mxu0 }
 0x435   : > { %v1713_v17 = vpop.f32.mrb[10].mxu0 }
 0x436   : > { %v1715_v18 = vpop.f32.mrb[11].mxu0 }
 0x46c   : > { %v2143_v20 = vpop.f32.mrb[16].mxu1 }
 0x46d   : > { %v4286_v21 = vadd.f32 %v2143_v20, %v1707_v12  ;;  %v2145_v22 = vpop.f32.mrb[17].mxu1  ;;  %v3477_v20 = vld [vmem:[%s6095_s8 + $0xb8] sm:$0xff] }
 0x46e   : > { %v4287_v23 = vadd.f32 %v2145_v22, %v1709_v15  ;;  %v3479_v22 = vld [vmem:[%s6095_s8 + $0xc8] sm:$0xff] }
 0x46f   : > { %v2170_v48 = vadd.f32 %v4286_v21, %v2163_v57  ;;  %v4149_v21 = vpack.c.bf16 %v3477_v20, %v3476_v19  ;;  %v3496_v19 = vld [vmem:[%s6096_s9 + $0x50] sm:$0xff]  ;;  %v3497_v20 = vld [vmem:[%s6096_s9 + $0x58] sm:$0xff] }
 0x470   : > { %v2149_v24 = vpop.f32.mrb[18].mxu1  ;;  %v2171_v27 = vadd.f32 %v4287_v23, %v2167_v35 }
 0x471   : > { %v4288_v25 = vadd.f32 %v2149_v24, %v1713_v17  ;;  %v2151_v26 = vpop.f32.mrb[19].mxu1  ;;  %v2174_v31 = vmax.f32 %v2170_v48, 0.0  ;;  %v3481_v24 = vld [vmem:[%s6095_s8 + $0xd8] sm:$0xff] }
 0x472   : > { %v4289_v28 = vadd.f32 %v2151_v26, %v1715_v18  ;;  %v2175_v33 = vmax.f32 %v2171_v27, 0.0  ;;  %v4146_v18 = vpack.c.bf16 %v3475_v10, %v3474_v9  ;;  %v3483_v26 = vld [vmem:[%s6095_s8 + $0xe8] sm:$0xff]  ;;  %v2960_v10 = vld [vmem:[%s6098_s11 + $0x40] sm:$0xff] }
 0x473   : > { %v2172_v29 = vadd.f32 %v4288_v25, %v2163_v57  ;;  %v3478_v57 = vld [vmem:[%s6095_s8 + $0xc0] sm:$0xff] }
 0x474   : > { %v2173_v30 = vadd.f32 %v4289_v28, %v2167_v35  ;;  %v4152_v23 = vpack.c.bf16 %v3479_v22, %v3478_v57  ;;  %v3480_v35 = vld [vmem:[%s6095_s8 + $0xd0] sm:$0xff]  ;;  %v3482_v25 = vld [vmem:[%s6095_s8 + $0xe0] sm:$0xff]  ;;  %v4191_v57 = vpack.c.bf16 %v3497_v20, %v3496_v19 }
 0x475   : > { %v2176_v32 = vmax.f32 %v2172_v29, 0.0  ;;  %v4155_v48 = vpack.c.bf16 %v3481_v24, %v3480_v35  ;;  %v4158_v27 = vpack.c.bf16 %v3483_v26, %v3482_v25  ;;  %v3484_v28 = vld [vmem:[%s6095_s8 + $0xf0] sm:$0xff]  ;;  %v3485_v29 = vld [vmem:[%s6095_s8 + $0xf8] sm:$0xff]  ;;  %v3498_v35 = vld [vmem:[%s6096_s9 + $0x60] sm:$0xff] }
 0x476   : > { %v2177_v34 = vmax.f32 %v2173_v30, 0.0  ;;  %v4161_v30 = vpack.c.bf16 %v3485_v29, %v3484_v28  ;;  %v3499_v24 = vld [vmem:[%s6096_s9 + $0x68] sm:$0xff]  ;;  %v3500_v25 = vld [vmem:[%s6096_s9 + $0x70] sm:$0xff]  ;;  %v3501_v26 = vld [vmem:[%s6096_s9 + $0x78] sm:$0xff] }
 0x477   : > { %v4106_v36 = vpack.c.bf16 %v2176_v32, %v2174_v31  ;;  %v3486_v31 = vld [vmem:[%s6095_s8 + $0x100] sm:$0xff]  ;;  %v3487_v32 = vld [vmem:[%s6095_s8 + $0x108] sm:$0xff] }
 0x478   : > { %v4103_v14 = vpack.c.bf16 %v2177_v34, %v2175_v33  ;;  %v4164_v33 = vpack.c.bf16 %v3487_v32, %v3486_v31  ;;  %v3488_v34 = vld [vmem:[%s6095_s8 + $0x110] sm:$0xff]  ;;  %v3502_v28 = vld [vmem:[%s6096_s9 + $0x80] sm:$0xff]  ;;  %v3503_v29 = vld [vmem:[%s6096_s9 + $0x88] sm:$0xff] }
 0x479   : > { %v3504_v31 = vld [vmem:[%s6096_s9 + $0x90] sm:$0xff]  ;;  %v3505_v32 = vld [vmem:[%s6096_s9 + $0x98] sm:$0xff]  ;;  %v3537_v20 = vld [vmem:[%s6096_s9 + $0x180] sm:$0xff] }
 0x47a   : > { %4105 = vmatprep.subr.msk.bf16.mxu0 %vm4104_vm11, %v4103_v14 }
 0x47b   : > { %4108 = vmatpush1.bf16.msk.msra.mxu0 %vm4104_vm11, %v4106_v36 }
 0x47c   : > { %4111 = vmatprep.subr.msk.bf16.mxu0 %vm4104_vm11, %v4103_v14 }
 0x47e   : > { %3468 = vmatmul.mubr.msk.f32.vlgmr.msra.gmra.mrb[12].mxu0 %vm2179_vm12, %v2178_v13  ;;  %v3490_v13 = vld [vmem:[%s6095_s8 + $0x120] sm:$0xff] }
 0x47f   : > { %4114 = vmatpush1.bf16.msk.msra.mxu0 %vm4104_vm11, %v4106_v36  ;;  %2330 = vmatprep.mubr.f32.mxu0 %v4450_v7  ;;  %v3489_v36 = vld [vmem:[%s6095_s8 + $0x118] sm:$0xff]  ;;  %v4170_v37 = vpack.c.bf16 %v3491_v16, %v3490_v13  ;;  %v3509_v16 = vld [vmem:[%s6096_s9 + $0xb0] sm:$0xff] }
 0x480   : > { %4115 = vmatprep.subr.bf16.mxu0 %v4452_v53  ;;  %v4167_v14 = vpack.c.bf16 %v3489_v36, %v3488_v34  ;;  %v3507_v34 = vld [vmem:[%s6096_s9 + $0xa0] sm:$0xff]  ;;  %v3508_v36 = vld [vmem:[%s6096_s9 + $0xa8] sm:$0xff] }
 0x482   : > { %3472 = vmatmul.mubr.msk.f32.vlgmr.msra.gmra.mrb[14].mxu0 %vm2179_vm12, %v3469_v38  ;;  %v3492_v38 = vld [vmem:[%s6095_s8 + $0x130] sm:$0xff] }
 0x483   : > { %4117 = vmatpush1.bf16.msra.mxu0 %v4116_v39  ;;  %v3493_v39 = vld [vmem:[%s6095_s8 + $0x138] sm:$0xff] }
 0x484   : > { %4118 = vmatprep.subr.bf16.mxu0 %v4452_v53  ;;  %v4173_v40 = vpack.c.bf16 %v3493_v39, %v3492_v38  ;;  %v3511_v39 = vld [vmem:[%s6096_s9 + $0xc0] sm:$0xff] }
 0x487   : > { %4120 = vmatpush1.bf16.msra.mxu0 %v4119_v42  ;;  %v2527_v42 = vld [vmem:[%s6096_s9 + $0x8] sm:$0xff] }
 0x488   : > { %4121 = vmatprep.subr.bf16.mxu0 %v4452_v53  ;;  %v4176_v44 = vpack.c.bf16 %v2527_v42, %v2526_v41  ;;  %v3513_v42 = vld [vmem:[%s6096_s9 + $0xd0] sm:$0xff] }
 0x48a   : > { %4177 = vmatpush3.bf16.msra.mxu1 %v4176_v44 }
 0x48b   : > { %4123 = vmatpush1.bf16.msra.mxu0 %v4122_v45  ;;  %v2529_v45 = vld [vmem:[%s6096_s9 + $0x18] sm:$0xff]  ;;  %4178 = vmatprep.subr.bf16.mxu1 %v4452_v53 }
 0x48c   : > { %4124 = vmatprep.subr.bf16.mxu0 %v4452_v53  ;;  %v4179_v46 = vpack.c.bf16 %v2529_v45, %v2528_v43  ;;  %v3514_v43 = vld [vmem:[%s6096_s9 + $0xd8] sm:$0xff]  ;;  %v3515_v45 = vld [vmem:[%s6096_s9 + $0xe0] sm:$0xff] }
 0x48d   : > { %v4215_v44 = vpack.c.bf16 %v3514_v43, %v3513_v42  ;;  %v3053_v43 = vld [vmem:[%s6100_s13 + $0x50] sm:$0xf] }
 0x48e   : > { %4180 = vmatpush3.bf16.msra.mxu1 %v4179_v46  ;;  %v3516_v46 = vld [vmem:[%s6096_s9 + $0xe8] sm:$0xff] }
 0x48f   : > { %4126 = vmatpush1.bf16.msra.mxu0 %v4125_v50  ;;  %v2531_v50 = vld [vmem:[%s6096_s9 + $0x28] sm:$0xff]  ;;  %4181 = vmatprep.subr.bf16.mxu1 %v4452_v53 }
 0x490   : > { %4127 = vmatprep.subr.bf16.mxu0 %v4452_v53  ;;  %v4182_v51 = vpack.c.bf16 %v2531_v50, %v2530_v49  ;;  %v4218_v49 = vpack.c.bf16 %v3516_v46, %v3515_v45  ;;  %v3518_v50 = vld [vmem:[%s6096_s9 + $0xf0] sm:$0xff] }
 0x492   : > { %4183 = vmatpush3.bf16.msra.mxu1 %v4182_v51  ;;  %v3519_v51 = vld [vmem:[%s6096_s9 + $0xf8] sm:$0xff] }
 0x493   : > { %4129 = vmatpush1.bf16.msra.mxu0 %v4128_v54  ;;  %v2533_v54 = vld [vmem:[%s6096_s9 + $0x38] sm:$0xff]  ;;  %4184 = vmatprep.subr.bf16.mxu1 %v4452_v53 }
 0x494   : > { %4130 = vmatprep.subr.bf16.mxu0 %v4452_v53  ;;  %v4185_v55 = vpack.c.bf16 %v2533_v54, %v2532_v52  ;;  %v4221_v52 = vpack.c.bf16 %v3519_v51, %v3518_v50 }
 0x496   : > { %4186 = vmatpush3.bf16.msra.mxu1 %v4185_v55  ;;  %v3520_v55 = vld [vmem:[%s6096_s9 + $0x100] sm:$0xff] }
 0x497   : > { %4132 = vmatpush1.bf16.msra.mxu0 %v4131_v59  ;;  %v2535_v59 = vld [vmem:[%s6096_s9 + $0x48] sm:$0xff]  ;;  %4187 = vmatprep.subr.bf16.mxu1 %v4452_v53 }
 0x498   : > { %4133 = vmatprep.subr.bf16.mxu0 %v4452_v53  ;;  %v4188_v60 = vpack.c.bf16 %v2535_v59, %v2534_v58  ;;  %v3521_v58 = vld [vmem:[%s6096_s9 + $0x108] sm:$0xff] }
 0x499   : > { %v4224_v59 = vpack.c.bf16 %v3521_v58, %v3520_v55 }
 0x49a   : > { %4189 = vmatpush3.bf16.msra.mxu1 %v4188_v60  ;;  %v3522_v60 = vld [vmem:[%s6096_s9 + $0x110] sm:$0xff] }
 0x49b   : > { %4135 = vmatpush1.bf16.msra.mxu0 %v4134_v62  ;;  %4190 = vmatprep.subr.bf16.mxu1 %v4452_v53  ;;  %v2953_v62 = vld [vmem:[%s6098_s11 + $0x8] sm:$0xff] }
 0x49c   : > { %4136 = vmatprep.subr.bf16.mxu0 %v4452_v53  ;;  %v4251_v63 = vpack.c.bf16 %v2953_v62, %v2952_v61  ;;  %v3523_v61 = vld [vmem:[%s6096_s9 + $0x118] sm:$0xff] }
 0x49d   : > { %v4227_v62 = vpack.c.bf16 %v3523_v61, %v3522_v60 }
 0x49f   : > { %4138 = vmatpush1.bf16.msra.mxu0 %v4137_v0  ;;  %v2955_v0 = vld [vmem:[%s6098_s11 + $0x18] sm:$0xff] }
 0x4a0   : > { %4139 = vmatprep.subr.bf16.mxu0 %v4452_v53  ;;  %v4254_v1 = vpack.c.bf16 %v2955_v0, %v2954_v56  ;;  %v3524_v56 = vld [vmem:[%s6096_s9 + $0x120] sm:$0xff] }
 0x4a3   : > { %4141 = vmatpush1.bf16.msra.mxu0 %v4140_v3  ;;  %v2957_v3 = vld [vmem:[%s6098_s11 + $0x28] sm:$0xff] }
 0x4a4   : > { %4142 = vmatprep.subr.bf16.mxu0 %v4452_v53 }
 0x4a7   : > { %4144 = vmatpush1.bf16.msra.mxu0 %v4143_v5  ;;  %v4257_v5 = vpack.c.bf16 %v2957_v3, %v2956_v2  ;;  %v3527_v2 = vld [vmem:[%s6096_s9 + $0x138] sm:$0xff] }
 0x4a8   : > { %4145 = vmatprep.subr.bf16.mxu0 %v4452_v53 }
 0x551   : > { %v2256_v6 = vpop.f32.mrb[12].mxu0 }
 0x552   : > { %v2258_v8 = vpop.f32.mrb[13].mxu0 }
 0x555   : > { %v2332_v11 = vpop.f32.mrb[14].mxu0 }
 0x556   : > { %v2337_v12 = vmax.f32 %v2256_v6, %v2332_v11  ;;  %v2334_v15 = vpop.f32.mrb[15].mxu0  ;;  %v2958_v6 = vld [vmem:[%s6098_s11 + $0x30] sm:$0xff]  ;;  %v2961_v11 = vld [vmem:[%s6098_s11 + $0x48] sm:$0xff] }
 0x557   : > { %v2338_v17 = vmax.f32 %v2258_v8, %v2334_v15  ;;  %v2959_v8 = vld [vmem:[%s6098_s11 + $0x38] sm:$0xff]  ;;  %v2962_v15 = vld [vmem:[%s6098_s11 + $0x50] sm:$0xff] }
 0x558   : > { %v4260_v9 = vpack.c.bf16 %v2959_v8, %v2958_v6  ;;  %v3531_v8 = vld [vmem:[%s6096_s9 + $0x150] sm:$0xff] }
 0x559   : > { %3473 = vmatprep.mubr.msk.f32.mxu0 %vm2359_vm13, %v2338_v17 }
 0x55a   : > { %2428 = vmatmul.mubr.f32.vlgmr.msra.gmra.mrb[16].mxu0 %v2337_v12 }
 0x55b   : > { %4147 = vmatpush1.bf16.msra.mxu0 %v4146_v18  ;;  %3494 = vmatprep.mubr.msk.f32.mxu0 %vm2359_vm13, %v2338_v17  ;;  %v2963_v17 = vld [vmem:[%s6098_s11 + $0x58] sm:$0xff] }
 0x55c   : > { %4148 = vmatprep.subr.bf16.mxu0 %v4452_v53  ;;  %v4266_v18 = vpack.c.bf16 %v2963_v17, %v2962_v15  ;;  %v3535_v17 = vld [vmem:[%s6096_s9 + $0x170] sm:$0xff] }
 0x55f   : > { %4150 = vmatpush1.bf16.msra.mxu0 %v4149_v21 }
 0x560   : > { %4151 = vmatprep.subr.bf16.mxu0 %v4452_v53 }
 0x563   : > { %4153 = vmatpush1.bf16.msra.mxu0 %v4152_v23 }
 0x564   : > { %4154 = vmatprep.subr.bf16.mxu0 %v4452_v53 }
 0x567   : > { %4156 = vmatpush1.bf16.msra.mxu0 %v4155_v48  ;;  %v4194_v48 = vpack.c.bf16 %v3499_v24, %v3498_v35  ;;  %v2964_v35 = vld [vmem:[%s6098_s11 + $0x60] sm:$0xff]  ;;  %v2965_v24 = vld [vmem:[%s6098_s11 + $0x68] sm:$0xff] }
 0x568   : > { %4157 = vmatprep.subr.bf16.mxu0 %v4452_v53 }
 0x56b   : > { %4159 = vmatpush1.bf16.msra.mxu0 %v4158_v27  ;;  %v4197_v27 = vpack.c.bf16 %v3501_v26, %v3500_v25  ;;  %v2966_v25 = vld [vmem:[%s6098_s11 + $0x70] sm:$0xff]  ;;  %v3043_v26 = vld [vmem:[%s6100_s13] sm:$0xff] }
 0x56c   : > { %4160 = vmatprep.subr.bf16.mxu0 %v4452_v53 }
 0x56f   : > { %4162 = vmatpush1.bf16.msra.mxu0 %v4161_v30  ;;  %v4200_v30 = vpack.c.bf16 %v3503_v29, %v3502_v28 }
 0x570   : > { %4163 = vmatprep.subr.bf16.mxu0 %v4452_v53 }
 0x573   : > { %4165 = vmatpush1.bf16.msra.mxu0 %v4164_v33  ;;  %v4203_v33 = vpack.c.bf16 %v3505_v32, %v3504_v31 }
 0x574   : > { %4166 = vmatprep.subr.bf16.mxu0 %v4452_v53 }
 0x577   : > { %4168 = vmatpush1.bf16.msra.mxu0 %v4167_v14  ;;  %v4206_v14 = vpack.c.bf16 %v3508_v36, %v3507_v34  ;;  %v3046_v34 = vld [vmem:[%s6100_s13 + $0x18] sm:$0xff] }
 0x578   : > { %4169 = vmatprep.subr.bf16.mxu0 %v4452_v53 }
 0x57b   : > { %4171 = vmatpush1.bf16.msra.mxu0 %v4170_v37  ;;  %v3510_v37 = vld [vmem:[%s6096_s9 + $0xb8] sm:$0xff] }
 0x57c   : > { %4172 = vmatprep.subr.bf16.mxu0 %v4452_v53  ;;  %v4209_v38 = vpack.c.bf16 %v3510_v37, %v3509_v16  ;;  %v3049_v37 = vld [vmem:[%s6100_s13 + $0x30] sm:$0xff] }
 0x57f   : > { %4174 = vmatpush1.bf16.msra.mxu0 %v4173_v40  ;;  %v3512_v40 = vld [vmem:[%s6096_s9 + $0xc8] sm:$0xff] }
 0x580   : > { %4250 = vmatprep.subr.bf16.mxu0 %v4452_v53  ;;  %v4212_v41 = vpack.c.bf16 %v3512_v40, %v3511_v39  ;;  %v3051_v40 = vld [vmem:[%s6100_s13 + $0x40] sm:$0xff] }
 0x582   : > { %2519 = vmatmul.mubr.f32.vlgmr.msra.gmra.mrb[18].mxu0 %v2337_v12  ;;  %v4263_v12 = vpack.c.bf16 %v2961_v11, %v2960_v10  ;;  %v3533_v11 = vld [vmem:[%s6096_s9 + $0x160] sm:$0xff] }
 0x583   : > { %3775 = vmatprep.mubr.msk.f32.mxu0 %vm4453_vm14, %v4450_v7  ;;  %4252 = vmatpush3.bf16.msra.mxu0 %v4251_v63  ;;  %v3525_v63 = vld [vmem:[%s6096_s9 + $0x128] sm:$0xff] }
 0x584   : > { %4253 = vmatprep.subr.bf16.mxu0 %v4452_v53  ;;  %v4230_v0 = vpack.c.bf16 %v3525_v63, %v3524_v56 }
 0x587   : > { %4255 = vmatpush3.bf16.msra.mxu0 %v4254_v1  ;;  %v3526_v1 = vld [vmem:[%s6096_s9 + $0x130] sm:$0xff] }
 0x588   : > { %4256 = vmatprep.subr.bf16.mxu0 %v4452_v53  ;;  %v4233_v3 = vpack.c.bf16 %v3527_v2, %v3526_v1 }
 0x58b   : > { %4258 = vmatpush3.bf16.msra.mxu0 %v4257_v5 }
 0x58c   : > { %4259 = vmatprep.subr.bf16.mxu0 %v4452_v53 }
 0x58f   : > { %4261 = vmatpush3.bf16.msra.mxu0 %v4260_v9  ;;  %v3532_v9 = vld [vmem:[%s6096_s9 + $0x158] sm:$0xff] }
 0x590   : > { %4262 = vmatprep.subr.bf16.mxu0 %v4452_v53  ;;  %v4239_v10 = vpack.c.bf16 %v3532_v9, %v3531_v8 }
 0x593   : > { %4264 = vmatpush3.bf16.msra.mxu0 %v4263_v12  ;;  %v3534_v12 = vld [vmem:[%s6096_s9 + $0x168] sm:$0xff] }
 0x594   : > { %4265 = vmatprep.subr.bf16.mxu0 %v4452_v53  ;;  %v4242_v15 = vpack.c.bf16 %v3534_v12, %v3533_v11 }
 0x597   : > { %4267 = vmatpush3.bf16.msra.mxu0 %v4266_v18  ;;  %v3536_v18 = vld [vmem:[%s6096_s9 + $0x178] sm:$0xff] }
 0x598   : > { %4268 = vmatprep.subr.bf16.mxu0 %v4452_v53  ;;  %v4245_v19 = vpack.c.bf16 %v3536_v18, %v3535_v17 }
 0x62d   : > { %v2429_v47 = vpop.f32.mrb[16].mxu0 }
 0x62e   : > { %v2431_v4 = vpop.f32.mrb[17].mxu0 }
 0x62f   : > { %v3530_v4 = vld [vmem:[%s6096_s9 + $0x148] sm:$0xff] }
 0x655   : > { %v2520_v21 = vpop.f32.mrb[18].mxu0 }
 0x656   : > { %v5825_v22 = vmax.f32 %v2429_v47, %v2520_v21  ;;  %v2522_v23 = vpop.f32.mrb[19].mxu0  ;;  %v3529_v47 = vld [vmem:[%s6096_s9 + $0x140] sm:$0xff]  ;;  %v3538_v21 = vld [vmem:[%s6096_s9 + $0x188] sm:$0xff] }
 0x657   : > { %v4236_v5 = vpack.c.bf16 %v3530_v4, %v3529_v47 }
 0x658   : > { %3651 = vmatmul.mubr.msk.f32.vlgmr.msra.gmra.mrb[20].mxu1 %vm2536_vm15, %v5825_v22  ;;  %v2622_v13 = vrot.slane %v5825_v22, 1  ;;  %v2707_v54 = vrot.slane %v5825_v22, 2  ;;  %v2792_v6 = vrot.slane %v5825_v22, 3  ;;  %v2877_v23 = vrot.slane %v5825_v22, 4  ;;  %v2525_v22 = vld [vmem:[%s6097_s10] sm:$0x1] }
 0x659   : > { %4192 = vmatpush3.bf16.msra.mxu1 %v4191_v57  ;;  %3673 = vmatprep.mubr.msk.f32.mxu1 %vm4453_vm14, %v4450_v7  ;;  %v4248_v57 = vpack.c.bf16 %v3538_v21, %v3537_v20 }
 0x65a   : > { %4193 = vmatprep.subr.bf16.mxu1 %v4452_v53 }
 0x65d   : > { %4195 = vmatpush3.bf16.msra.mxu1 %v4194_v48  ;;  %v4269_v48 = vpack.c.bf16 %v2965_v24, %v2964_v35 }
 0x65e   : > { %4196 = vmatprep.subr.bf16.mxu1 %v4452_v53 }
 0x65f   : > { %4270 = vmatpush3.bf16.msra.mxu0 %v4269_v48 }
 0x660   : > { %3773 = vmatprep.subr.mxu0 %v4450_v7 }
 0x661   : > { %4198 = vmatpush3.bf16.msra.mxu1 %v4197_v27  ;;  %v3044_v27 = vld [vmem:[%s6100_s13 + $0x8] sm:$0xff] }
 0x662   : > { %4199 = vmatprep.subr.bf16.mxu1 %v4452_v53  ;;  %v4272_v31 = vpack.c.bf16 %v3044_v27, %v3043_v26 }
 0x663   : > { %3774 = vmatpush3.msra.mxu0 %v2966_v25 }
 0x664   : > { %4271 = vmatprep.subr.bf16.mxu0 %v4452_v53 }
 0x665   : > { %4201 = vmatpush3.bf16.msra.mxu1 %v4200_v30 }
 0x666   : > { %4202 = vmatprep.subr.bf16.mxu1 %v4452_v53 }
 0x669   : > { %4204 = vmatpush3.bf16.msra.mxu1 %v4203_v33  ;;  %v3045_v33 = vld [vmem:[%s6100_s13 + $0x10] sm:$0xff] }
 0x66a   : > { %4205 = vmatprep.subr.bf16.mxu1 %v4452_v53  ;;  %v4275_v36 = vpack.c.bf16 %v3046_v34, %v3045_v33 }
 0x66c   : > { %3674 = vmatmul.mubr.msk.f32.vlgmr.msra.gmra.mrb[20].mxu1 %vm2536_vm15, %v2622_v13  ;;  %v3048_v13 = vld [vmem:[%s6100_s13 + $0x28] sm:$0xff] }
 0x66d   : > { %4207 = vmatpush3.bf16.msra.mxu1 %v4206_v14  ;;  %3696 = vmatprep.mubr.msk.f32.mxu1 %vm4453_vm14, %v4450_v7  ;;  %v3047_v14 = vld [vmem:[%s6100_s13 + $0x20] sm:$0xff] }
 0x66e   : > { %4208 = vmatprep.subr.bf16.mxu1 %v4452_v53  ;;  %v4278_v16 = vpack.c.bf16 %v3048_v13, %v3047_v14 }
 0x671   : > { %4210 = vmatpush3.bf16.msra.mxu1 %v4209_v38  ;;  %v3050_v38 = vld [vmem:[%s6100_s13 + $0x38] sm:$0xff] }
 0x672   : > { %4211 = vmatprep.subr.bf16.mxu1 %v4452_v53  ;;  %v4281_v39 = vpack.c.bf16 %v3050_v38, %v3049_v37 }
 0x675   : > { %4213 = vmatpush3.bf16.msra.mxu1 %v4212_v41  ;;  %v3052_v41 = vld [vmem:[%s6100_s13 + $0x48] sm:$0xff] }
 0x676   : > { %4214 = vmatprep.subr.bf16.mxu1 %v4452_v53  ;;  %v4284_v42 = vpack.c.bf16 %v3052_v41, %v3051_v40 }
 0x679   : > { %4216 = vmatpush3.bf16.msra.mxu1 %v4215_v44 }
 0x67a   : > { %4217 = vmatprep.subr.bf16.mxu1 %v4452_v53 }
 0x67d   : > { %4219 = vmatpush3.bf16.msra.mxu1 %v4218_v49 }
 0x67e   : > { %4220 = vmatprep.subr.bf16.mxu1 %v4452_v53 }
 0x680   : > { %3697 = vmatmul.mubr.msk.f32.vlgmr.msra.gmra.mrb[20].mxu1 %vm2536_vm15, %v2707_v54 }
 0x681   : > { %4222 = vmatpush3.bf16.msra.mxu1 %v4221_v52  ;;  %3719 = vmatprep.mubr.msk.f32.mxu1 %vm4453_vm14, %v4450_v7 }
 0x682   : > { %4223 = vmatprep.subr.bf16.mxu1 %v4452_v53 }
 0x685   : > { %4225 = vmatpush3.bf16.msra.mxu1 %v4224_v59 }
 0x686   : > { %4226 = vmatprep.subr.bf16.mxu1 %v4452_v53 }
 0x689   : > { %4228 = vmatpush3.bf16.msra.mxu1 %v4227_v62 }
 0x68a   : > { %4229 = vmatprep.subr.bf16.mxu1 %v4452_v53 }
 0x68d   : > { %4231 = vmatpush3.bf16.msra.mxu1 %v4230_v0 }
 0x68e   : > { %4232 = vmatprep.subr.bf16.mxu1 %v4452_v53 }
 0x691   : > { %4234 = vmatpush3.bf16.msra.mxu1 %v4233_v3 }
 0x692   : > { %4235 = vmatprep.subr.bf16.mxu1 %v4452_v53 }
 0x694   : > { %3720 = vmatmul.mubr.msk.f32.vlgmr.msra.gmra.mrb[20].mxu1 %vm2536_vm15, %v2792_v6 }
 0x695   : > { %4237 = vmatpush3.bf16.msra.mxu1 %v4236_v5  ;;  %3742 = vmatprep.mubr.msk.f32.mxu1 %vm4453_vm14, %v4450_v7 }
 0x696   : > { %4238 = vmatprep.subr.bf16.mxu1 %v4452_v53 }
 0x699   : > { %4240 = vmatpush3.bf16.msra.mxu1 %v4239_v10 }
 0x69a   : > { %4241 = vmatprep.subr.bf16.mxu1 %v4452_v53 }
 0x69d   : > { %4243 = vmatpush3.bf16.msra.mxu1 %v4242_v15 }
 0x69e   : > { %4244 = vmatprep.subr.bf16.mxu1 %v4452_v53 }
 0x6a1   : > { %4246 = vmatpush3.bf16.msra.mxu1 %v4245_v19 }
 0x6a2   : > { %4247 = vmatprep.subr.bf16.mxu1 %v4452_v53 }
 0x6a5   : > { %4249 = vmatpush3.bf16.msra.mxu1 %v4248_v57 }
 0x6a8   : > { %3743 = vmatmul.mubr.msk.f32.vlgmr.msra.gmra.mrb[20].mxu1 %vm2536_vm15, %v2877_v23 }
 0x77b   : > { %v2946_v28 = vpop.f32.mrb[20].mxu1 }
 0x77c   : > { %v4290_v29 = vadd.f32 %v2946_v28, %v2525_v22  ;;  %v3744_v30 = vpop.f32.mrb[21].mxu1 }
 0x77e   : > { %v2951_v32 = vmax.f32 %v4290_v29, 0.0 }
 0x780   : > { %3776 = vmatmul.mubr.msk.f32.vlgmr.msra.gmra.mrb[20].mxu0 %vm2968_vm0, %v2951_v32 }
 0x781   : > { %4273 = vmatpush3.bf16.msra.mxu0 %v4272_v31  ;;  %3800 = vmatprep.mubr.msk.f32.mxu0 %vm4453_vm14, %v4450_v7 }
 0x782   : > { %4274 = vmatprep.subr.bf16.mxu0 %v4452_v53 }
 0x785   : > { %4276 = vmatpush3.bf16.msra.mxu0 %v4275_v36 }
 0x786   : > { %4277 = vmatprep.subr.bf16.mxu0 %v4452_v53 }
 0x789   : > { %4279 = vmatpush3.bf16.msra.mxu0 %v4278_v16 }
 0x78a   : > { %4280 = vmatprep.subr.bf16.mxu0 %v4452_v53 }
 0x78d   : > { %4282 = vmatpush3.bf16.msra.mxu0 %v4281_v39 }
 0x78e   : > { %4283 = vmatprep.subr.bf16.mxu0 %v4452_v53  ;;  %v2967_v53 = vld [vmem:[%s6099_s12] sm:$0x1] }
 0x791   : > { %4285 = vmatpush3.bf16.msra.mxu0 %v4284_v42 }
 0x792   : > { %3798 = vmatprep.subr.mxu0 %v4450_v7  ;;  %v3054_v7 = vld [vmem:[%s6101_s14] sm:$0x1] }
 0x795   : > { %3799 = vmatpush3.msk.msra.mxu0 %vm1203_vm1, %v3053_v43  ;;  %vm3131_vm1 = vcmask 73728  }
 0x853   : > { %v3038_v44 = vpop.f32.mrb[20].mxu0 }
 0x854   : > { %v3039_v45 = vadd.f32 %v3038_v44, %v2967_v53  ;;  %v3777_v46 = vpop.f32.mrb[21].mxu0 }
 0x856   : > { %v3042_v49 = vmax.f32 %v3039_v45, 0.0 }
 0x858   : > { %3801 = vmatmul.mubr.msk.f32.vlgmr.msra.gmra.mrb[22].mxu0 %vm1630_vm6, %v3042_v49 }
 0x92b   : > { %v3127_v50 = vpop.f32.mrb[22].mxu0 }
 0x92c   : > { %v3128_v51 = vadd.f32 %v3127_v50, %v3054_v7  ;;  %v3802_v52 = vpop.f32.mrb[23].mxu0 }
 0x92e   : > { %3132 = vst.msk [vmem:[%s486_s25] sm:$0x1] %vm3131_vm1, %v3128_v51 }
 0x92f   : > { %4399 = shalt.err (!%p4396_p3)
}
 0x930   : > { %s4400_s29 = scalar_lea.hbm %s6045_s27, 16  ;;  %s4404_s25 = scalar_lea.hbm %s6102_s15, 32 }
 0x931   : > { %p4401_p4 = scmp.ne.s32.totalorder %s6045_s27, %s4400_s29  ;;  %p4405_p9 = scmp.lt.u32.totalorder %s6045_s27, %s6102_s15 }
 0x932   : > { %p4406_p10 = scmp.lt.u32.totalorder %s4404_s25, %s4400_s29  ;;  %p4408_p12 = scmp.lt.u32.totalorder %s4400_s29, %s6045_s27 }
 0x933   : > { %p4402_p7 = pnand %p4401_p4, %p4573_p5 }
 0x934   : > { %p4407_p11 = por %p4406_p10, %p4405_p9 }
 0x935   : > { %p4403_p8 = pneg %p4402_p7 }
 0x936   : > { %p4409_p13 = por %p4408_p12, %p4407_p11 }
 0x938   : > { %p4410_p0 = pnand %p4409_p13, %p4403_p8 }
 0x93a   : > { %4413 = shalt.err (!%p4410_p0)
}
 0x93b   : > { %4343 = dma.vmem_to_hbm [thread:$0]  (%p4573_p5), %s6047_s26, 16, %s6045_s27, %s3134_s24  }
 0x93c PF: > { %s6117_s17 = sld [smem:[#allocation7_spill]]  ;;  %s6118_s22 = sld [smem:[#allocation5_spill]] }
 0x942   : > { %p4349_p1 = scmp.ge.s32.totalorder %s6117_s17, 2  ;;  %s3158_s18 = sand.u32 1, %s6118_s22  }
 0x943   : > { %s3159_s30 = scalar_lea.sflag [#allocation3], %s3158_s18 }
 0x944   : > { %p4346_p2 = pnand %p4349_p1, %p4577_p6 }
 0x946   : > { %4431 = dma.done.wait (!%p4346_p2), %s3159_s30, 16  }
 0x947   : > { %4433 = vsyncadd (!%p4346_p2), %s3159_s30, 4294967280  ;;  %s6120_s21 = sld [smem:[#allocation8_spill]]  ;;  %s6121_s29 = sld [smem:[#allocation6_spill]] }
 0x948   : > { %s6122_s20 = sld [smem:[#allocation9_spill]]  ;;  %s6123_s18 = smov %s4440_s19 }
 0x94d   : > { %p25_p3 = scmp.ge.s32.totalorder %s6120_s21, 4   ;;  %s6124_s19 = smov %s6121_s29 }
 0x94f   :  { %27 = sbr.rel (!%p25_p3) target bundleno = 3 (0x3), region = 131 }
 0x956   :  { %3163 = vsyncpa [#allocation3], 1 }
 0x957   :  { %3165 = vsyncpa [#allocation3 + $0x1], 1 }

</bundles_post_ra>
